<compile_context>
chip_gen: v6e
topology: v6e:2x2x1
jax: 0.10.0
libtpu: 0.0.40
codegen_flags: <defaults>
</compile_context>

<pallas_src>
import functools
import math

import jax
import jax.numpy as jnp
from jax.experimental import pallas as pl
from jax.experimental.pallas import tpu as pltpu


def _self_attn_kernel(feat_ref, pos_ref, posq_ref,
                      gamma_ref, beta_ref,
                      wq_ref, bq_ref,
                      wk_ref, bk_ref,
                      wv_ref, bv_ref,
                      wo_ref, bo_ref,
                      out_ref,
                      xn_sc, kh_sc, vh_sc,
                      *, nhead: int, eps: float, q_tile: int):
    """One (batch b, query-tile qi) grid step.

    feat_ref : (1, S, E) f32   -- full sequence slab of batch b (residual + LN input)
    pos_ref  : (1, S, E) bf16  -- full slab, K path (read only at qi == 0)
    posq_ref : (1, TQ, E) bf16 -- this step's query rows of pos
    out_ref  : (1, TQ, E)      -- rows [qi*TQ, qi*TQ + TQ)
    wq/wk/wv/wo : (E, E) bf16  -- pre-transposed; softmax scale folded into wq/bq
    xn_sc    : (S, E) f32      -- LayerNorm output cache (per batch)
    kh_sc/vh_sc : (H, S, D) bf16 -- head-major K / V cache (per batch)
    """
    S, E = feat_ref.shape[1], feat_ref.shape[2]
    H = nhead
    D = E // H
    TQ = q_tile

    # ---- once per batch: LayerNorm + K/V projections, cached in scratch ----
    @pl.when(pl.program_id(1) == 0)
    def _():
        x = feat_ref[0]                                        # (S, E) f32
        mean = jnp.mean(x, axis=-1, keepdims=True)
        centered = x - mean
        var = jnp.mean(centered * centered, axis=-1, keepdims=True)
        xn = (centered * jax.lax.rsqrt(var + eps)) * gamma_ref[0] + beta_ref[0]
        xn_sc[...] = xn                                        # f32 cache for the Q path

        xn_bf = xn.astype(jnp.bfloat16)
        k_in = xn_bf + pos_ref[0]                              # (S, E) bf16
        k = jnp.dot(k_in, wk_ref[...],
                    preferred_element_type=jnp.float32) + bk_ref[0]    # (S, E) f32
        v = jnp.dot(xn_bf, wv_ref[...],
                    preferred_element_type=jnp.float32) + bv_ref[0]    # (S, E) f32
        kh_sc[...] = k.reshape(S, H, D).transpose(1, 0, 2).astype(jnp.bfloat16)
        vh_sc[...] = v.reshape(S, H, D).transpose(1, 0, 2).astype(jnp.bfloat16)

    # ---- per query-tile step: Q projection on TQ rows only ----
    if TQ == S:
        xn_rows = xn_sc[...]                                   # (TQ, E) f32
        x_res = feat_ref[0]                                    # (TQ, E) f32
    else:
        row0 = pl.multiple_of(pl.program_id(1) * TQ, TQ)
        xn_rows = xn_sc[pl.ds(row0, TQ), :]
        x_res = feat_ref[0, pl.ds(row0, TQ), :]

    q_in = xn_rows.astype(jnp.bfloat16) + posq_ref[0]          # (TQ, E) bf16
    q = jnp.dot(q_in, wq_ref[...],
                preferred_element_type=jnp.float32) + bq_ref[0]        # scale pre-folded
    qh = q.reshape(TQ, H, D).transpose(1, 0, 2).astype(jnp.bfloat16)   # (H, TQ, D)

    # ---- head-batched attention against cached K/V ----
    kh = kh_sc[...]                                            # (H, S, D) bf16
    vh = vh_sc[...]                                            # (H, S, D) bf16
    scores = jnp.einsum('hqd,hkd->hqk', qh, kh,
                        preferred_element_type=jnp.float32)    # (H, TQ, S) f32
    m = jnp.max(scores, axis=-1, keepdims=True)
    p = jnp.exp(scores - m)                                    # f32 softmax stats
    denom = jnp.sum(p, axis=-1, keepdims=True)
    p = p * pl.reciprocal(denom, approx=True)                  # EUP slot

    ctx = jnp.einsum('hqk,hkd->hqd', p.astype(jnp.bfloat16), vh,
                     preferred_element_type=jnp.float32)       # (H, TQ, D) f32
    attn = ctx.transpose(1, 0, 2).reshape(TQ, E)               # (TQ, E) f32

    # ---- output projection + residual (un-normalized x) ----
    proj = jnp.dot(attn.astype(jnp.bfloat16), wo_ref[...],
                   preferred_element_type=jnp.float32) + bo_ref[0]
    out_ref[0] = (x_res + proj).astype(out_ref.dtype)


def transformer_self_attn_layer_bse(feat_bse, pos_bse, params, *, nhead: int,
                                    eps: float = 1e-5, q_tile: int = 128,
                                    vmem_limit_bytes: int = 48 * 1024 * 1024):
    """Core entry point: feat_bse, pos_bse are (B, S, E) float32. Returns (B, S, E)."""
    B, S, E = feat_bse.shape
    assert E % nhead == 0
    D = E // nhead

    tq = S if S <= q_tile else q_tile
    assert S % tq == 0, "sequence length must be divisible by the query tile"
    assert tq == S or tq % 8 == 0, "query tile must be a multiple of 8 (sublane)"
    nqt = S // tq

    # Host-side weight prep: pre-transpose, fold the 1/sqrt(D) softmax scale
    # into Wq/bq, keep MXU operands in bf16 (f32 accumulation in-kernel).
    scale = 1.0 / math.sqrt(D)
    wq = (params["wq"].T * scale).astype(jnp.bfloat16)                 # (E, E)
    bq = (params["bq"] * scale).astype(jnp.float32)                    # (1, E)
    wk = params["wk"].T.astype(jnp.bfloat16)
    wv = params["wv"].T.astype(jnp.bfloat16)
    wo = params["wo"].T.astype(jnp.bfloat16)

    feat_f32 = feat_bse.astype(jnp.float32)
    pos_bf = pos_bse.astype(jnp.bfloat16)      # pos only feeds bf16 MXU inputs

    kernel = functools.partial(_self_attn_kernel, nhead=nhead, eps=eps, q_tile=tq)

    slab = pl.BlockSpec((1, S, E), lambda b, qi: (b, 0, 0))    # full-S slab (constant over qi)
    qtile = pl.BlockSpec((1, tq, E), lambda b, qi: (b, qi, 0))  # per-step query tile

    def const(shape):
        return pl.BlockSpec(shape, lambda b, qi: (0,) * len(shape))

    # Updated cost model: Q/K/V/O projections once each over S rows per batch
    # plus the two attention matmuls; no per-tile recompute any more.
    flops = int(B * (8 * S * E * E + 4 * S * S * E))
    transcendentals = int(B * (nhead * S * S + S))
    bytes_accessed = int(B * S * E * (4 + 2 + 2 + 4) + 8 * E * E + 6 * 4 * E)

    out = pl.pallas_call(
        kernel,
        out_shape=jax.ShapeDtypeStruct((B, S, E), feat_bse.dtype),
        grid_spec=pltpu.PrefetchScalarGridSpec(
            num_scalar_prefetch=0,
            grid=(B, nqt),
            in_specs=[
                slab,                    # feat (f32): LN input + residual rows
                slab,                    # pos  (bf16): K path, read at qi == 0
                qtile,                   # pos  (bf16): Q path tile for this step
                const((1, E)),           # gamma
                const((1, E)),           # beta
                const((E, E)),           # wq (pre-transposed, scale folded)
                const((1, E)),           # bq (scale folded)
                const((E, E)),           # wk
                const((1, E)),           # bk
                const((E, E)),           # wv
                const((1, E)),           # bv
                const((E, E)),           # wo
                const((1, E)),           # bo
            ],
            out_specs=qtile,
            scratch_shapes=[
                pltpu.VMEM((S, E), jnp.float32),           # xn cache
                pltpu.VMEM((nhead, S, D), jnp.bfloat16),   # K head-major cache
                pltpu.VMEM((nhead, S, D), jnp.bfloat16),   # V head-major cache
            ],
        ),
        compiler_params=pltpu.CompilerParams(
            # qi must be "arbitrary": K/V/xn scratch is carried across qi steps.
            dimension_semantics=("parallel", "arbitrary"),
            vmem_limit_bytes=vmem_limit_bytes,
        ),
        cost_estimate=pl.CostEstimate(
            flops=flops,
            transcendentals=transcendentals,
            bytes_accessed=bytes_accessed,
        ),
    )(
        feat_f32, pos_bf, pos_bf,
        params["gamma"].astype(jnp.float32), params["beta"].astype(jnp.float32),
        wq, bq,
        wk, params["bk"].astype(jnp.float32),
        wv, params["bv"].astype(jnp.float32),
        wo, params["bo"].astype(jnp.float32),
    )
    return out


def transformer_self_attn_layer(feat, pos, params, *, nhead: int,
                                eps: float = 1e-5, q_tile: int = 128,
                                vmem_limit_bytes: int = 48 * 1024 * 1024):
    """(S, B, E) interface matching the PyTorch module layout.

    Prefer transformer_self_attn_layer_bse in end-to-end code: it avoids the
    two full HBM round trips these layout transposes cost.
    """
    feat_bse = jnp.transpose(feat, (1, 0, 2))
    pos_bse = jnp.transpose(pos, (1, 0, 2))
    out = transformer_self_attn_layer_bse(feat_bse, pos_bse, params, nhead=nhead,
                                          eps=eps, q_tile=q_tile,
                                          vmem_limit_bytes=vmem_limit_bytes)
    return jnp.transpose(out, (1, 0, 2))


def init_params(key, embed_dim: int):
    ks = jax.random.split(key, 8)
    s = 1.0 / math.sqrt(embed_dim)
    return {
        "gamma": jnp.ones((1, embed_dim), jnp.float32),
        "beta": jnp.zeros((1, embed_dim), jnp.float32),
        "wq": jax.random.normal(ks[0], (embed_dim, embed_dim), jnp.float32) * s,
        "bq": jax.random.normal(ks[1], (1, embed_dim), jnp.float32) * 0.01,
        "wk": jax.random.normal(ks[2], (embed_dim, embed_dim), jnp.float32) * s,
        "bk": jax.random.normal(ks[3], (1, embed_dim), jnp.float32) * 0.01,
        "wv": jax.random.normal(ks[4], (embed_dim, embed_dim), jnp.float32) * s,
        "bv": jax.random.normal(ks[5], (1, embed_dim), jnp.float32) * 0.01,
        "wo": jax.random.normal(ks[6], (embed_dim, embed_dim), jnp.float32) * s,
        "bo": jax.random.normal(ks[7], (1, embed_dim), jnp.float32) * 0.01,
    }


def _reference(feat, pos, params, nhead, eps=1e-5):
    # Pure-JAX f32 reference ((S, B, E) layout), for sanity checking.
    mean = jnp.mean(feat, axis=-1, keepdims=True)
    var = jnp.mean((feat - mean) ** 2, axis=-1, keepdims=True)
    xn = (feat - mean) / jnp.sqrt(var + eps) * params["gamma"][0] + params["beta"][0]
    qk_in = xn + pos
    q = qk_in @ params["wq"].T + params["bq"][0]
    k = qk_in @ params["wk"].T + params["bk"][0]
    v = xn @ params["wv"].T + params["bv"][0]
    S, B, E = feat.shape
    D = E // nhead
    qh = q.reshape(S, B, nhead, D)
    kh = k.reshape(S, B, nhead, D)
    vh = v.reshape(S, B, nhead, D)
    scores = jnp.einsum("sbhd,tbhd->bhst", qh, kh) / math.sqrt(D)
    p = jax.nn.softmax(scores, axis=-1)
    o = jnp.einsum("bhst,tbhd->sbhd", p, vh).reshape(S, B, E)
    return feat + o @ params["wo"].T + params["bo"][0]


if __name__ == "__main__":
    S, B, E, H = 16, 2, 32, 4
    key = jax.random.PRNGKey(0)
    k_feat, k_pos, k_par = jax.random.split(key, 3)
    feat = jax.random.normal(k_feat, (S, B, E), jnp.float32)
    pos = jax.random.normal(k_pos, (S, B, E), jnp.float32)
    params = init_params(k_par, E)

    # q_tile=8 with S=16 -> two query tiles per batch: exercises the
    # scratch-cached K/V reuse across qi and the tiled output path.
    out = transformer_self_attn_layer(feat, pos, params, nhead=H, q_tile=8)
    out = jax.block_until_ready(out)

    ref = _reference(feat, pos, params, H)
    assert out.shape == (S, B, E)
    # Kernel runs its matmuls with bf16 MXU operands (f32 accumulation) and a
    # bf16 pos slab, so compare against the f32 reference at bf16 tolerance.
    err = float(jnp.max(jnp.abs(out - ref)))
    tol = 5e-2 * float(jnp.max(jnp.abs(ref))) + 5e-2
    assert err < tol, f"mismatch vs reference: err={err} tol={tol}"
    print("KERNEL_OK")
</pallas_src>

<mosaic_0001>
module attributes {stable_mosaic.version = 11 : i64} {
  func.func @_self_attn_kernel(%arg0: i32, %arg1: i32, %arg2: memref<1x16x32xf32, #tpu.memory_space<vmem>>, %arg3: memref<1x16x32xbf16, #tpu.memory_space<vmem>>, %arg4: memref<1x8x32xbf16, #tpu.memory_space<vmem>>, %arg5: memref<1x32xf32, #tpu.memory_space<vmem>>, %arg6: memref<1x32xf32, #tpu.memory_space<vmem>>, %arg7: memref<32x32xbf16, #tpu.memory_space<vmem>>, %arg8: memref<1x32xf32, #tpu.memory_space<vmem>>, %arg9: memref<32x32xbf16, #tpu.memory_space<vmem>>, %arg10: memref<1x32xf32, #tpu.memory_space<vmem>>, %arg11: memref<32x32xbf16, #tpu.memory_space<vmem>>, %arg12: memref<1x32xf32, #tpu.memory_space<vmem>>, %arg13: memref<32x32xbf16, #tpu.memory_space<vmem>>, %arg14: memref<1x32xf32, #tpu.memory_space<vmem>>, %arg15: memref<1x8x32xf32, #tpu.memory_space<vmem>>, %arg16: memref<16x32xf32, #tpu.memory_space<vmem>>, %arg17: memref<4x16x8xbf16, #tpu.memory_space<vmem>>, %arg18: memref<4x16x8xbf16, #tpu.memory_space<vmem>>) attributes {dimension_semantics = [#tpu.dimension_semantics<parallel>, #tpu.dimension_semantics<arbitrary>], iteration_bounds = array<i64: 2, 2>, scalar_prefetch = 0 : i64, scratch_operands = 3 : i64, tpu.core_type = #tpu.core_type<tc>, window_params = [{transform_indices = @transform_0, window_bounds = array<i64: 1, 16, 32>}, {transform_indices = @transform_1, window_bounds = array<i64: 1, 16, 32>}, {transform_indices = @transform_2, window_bounds = array<i64: 1, 8, 32>}, {pipeline_mode = #tpu.pipeline_mode<synchronous>, transform_indices = @transform_3, window_bounds = array<i64: 1, 32>}, {pipeline_mode = #tpu.pipeline_mode<synchronous>, transform_indices = @transform_4, window_bounds = array<i64: 1, 32>}, {pipeline_mode = #tpu.pipeline_mode<synchronous>, transform_indices = @transform_5, window_bounds = array<i64: 32, 32>}, {pipeline_mode = #tpu.pipeline_mode<synchronous>, transform_indices = @transform_6, window_bounds = array<i64: 1, 32>}, {pipeline_mode = #tpu.pipeline_mode<synchronous>, transform_indices = @transform_7, window_bounds = array<i64: 32, 32>}, {pipeline_mode = #tpu.pipeline_mode<synchronous>, transform_indices = @transform_8, window_bounds = array<i64: 1, 32>}, {pipeline_mode = #tpu.pipeline_mode<synchronous>, transform_indices = @transform_9, window_bounds = array<i64: 32, 32>}, {pipeline_mode = #tpu.pipeline_mode<synchronous>, transform_indices = @transform_10, window_bounds = array<i64: 1, 32>}, {pipeline_mode = #tpu.pipeline_mode<synchronous>, transform_indices = @transform_11, window_bounds = array<i64: 32, 32>}, {pipeline_mode = #tpu.pipeline_mode<synchronous>, transform_indices = @transform_12, window_bounds = array<i64: 1, 32>}, {transform_indices = @transform_13, window_bounds = array<i64: 1, 8, 32>}]} {
    %c0_i32 = arith.constant 0 : i32
    %0 = arith.cmpi eq, %arg1, %c0_i32 : i32
    %1 = arith.extui %0 : i1 to i32
    %c0_i32_0 = arith.constant 0 : i32
    %2 = arith.cmpi ne, %1, %c0_i32_0 : i32
    scf.if %2 {
      %c0_28 = arith.constant 0 : index
      %c0_29 = arith.constant 0 : index
      %c0_30 = arith.constant 0 : index
      %53 = vector.load %arg2[%c0_28, %c0_29, %c0_30] : memref<1x16x32xf32, #tpu.memory_space<vmem>>, vector<1x16x32xf32>
      %54 = vector.shape_cast %53 : vector<1x16x32xf32> to vector<16x32xf32>
      %cst_31 = arith.constant dense<0.000000e+00> : vector<16xf32>
      %55 = vector.multi_reduction <add>, %54, %cst_31 [1] : vector<16x32xf32> to vector<16xf32>
      %56 = vector.shape_cast %55 : vector<16xf32> to vector<16x1xf32>
      %cst_32 = arith.constant 3.200000e+01 : f32
      %57 = vector.broadcast %cst_32 : f32 to vector<16x1xf32>
      %58 = arith.divf %56, %57 : vector<16x1xf32>
      %59 = vector.broadcast %58 : vector<16x1xf32> to vector<16x32xf32>
      %60 = arith.subf %54, %59 : vector<16x32xf32>
      %61 = arith.mulf %60, %60 : vector<16x32xf32>
      %cst_33 = arith.constant dense<0.000000e+00> : vector<16xf32>
      %62 = vector.multi_reduction <add>, %61, %cst_33 [1] : vector<16x32xf32> to vector<16xf32>
      %63 = vector.shape_cast %62 : vector<16xf32> to vector<16x1xf32>
      %cst_34 = arith.constant 3.200000e+01 : f32
      %64 = vector.broadcast %cst_34 : f32 to vector<16x1xf32>
      %65 = arith.divf %63, %64 : vector<16x1xf32>
      %cst_35 = arith.constant 9.99999974E-6 : f32
      %66 = vector.broadcast %cst_35 : f32 to vector<16x1xf32>
      %67 = arith.addf %65, %66 : vector<16x1xf32>
      %68 = math.rsqrt %67 : vector<16x1xf32>
      %69 = vector.broadcast %68 : vector<16x1xf32> to vector<16x32xf32>
      %70 = arith.mulf %60, %69 : vector<16x32xf32>
      %c0_36 = arith.constant 0 : index
      %c0_37 = arith.constant 0 : index
      %71 = vector.load %arg5[%c0_36, %c0_37] : memref<1x32xf32, #tpu.memory_space<vmem>>, vector<1x32xf32>
      %72 = vector.shape_cast %71 : vector<1x32xf32> to vector<32xf32>
      %73 = vector.shape_cast %72 : vector<32xf32> to vector<1x32xf32>
      %74 = vector.broadcast %73 : vector<1x32xf32> to vector<16x32xf32>
      %75 = arith.mulf %70, %74 : vector<16x32xf32>
      %c0_38 = arith.constant 0 : index
      %c0_39 = arith.constant 0 : index
      %76 = vector.load %arg6[%c0_38, %c0_39] : memref<1x32xf32, #tpu.memory_space<vmem>>, vector<1x32xf32>
      %77 = vector.shape_cast %76 : vector<1x32xf32> to vector<32xf32>
      %78 = vector.shape_cast %77 : vector<32xf32> to vector<1x32xf32>
      %79 = vector.broadcast %78 : vector<1x32xf32> to vector<16x32xf32>
      %80 = arith.addf %75, %79 : vector<16x32xf32>
      %c0_40 = arith.constant 0 : index
      %c0_41 = arith.constant 0 : index
      %81 = vector.load %arg16[%c0_40, %c0_41] : memref<16x32xf32, #tpu.memory_space<vmem>>, vector<16x32xf32>
      tpu.vector_store %arg16[%c0_40, %c0_41], %80 {strides = array<i32>} : memref<16x32xf32, #tpu.memory_space<vmem>>, vector<16x32xf32>,
      %82 = arith.truncf %80 : vector<16x32xf32> to vector<16x32xbf16>
      %c0_42 = arith.constant 0 : index
      %c0_43 = arith.constant 0 : index
      %c0_44 = arith.constant 0 : index
      %83 = vector.load %arg3[%c0_42, %c0_43, %c0_44] : memref<1x16x32xbf16, #tpu.memory_space<vmem>>, vector<1x16x32xbf16>
      %84 = vector.shape_cast %83 : vector<1x16x32xbf16> to vector<16x32xbf16>
      %85 = arith.addf %82, %84 : vector<16x32xbf16>
      %c0_45 = arith.constant 0 : index
      %c0_46 = arith.constant 0 : index
      %86 = vector.load %arg9[%c0_45, %c0_46] : memref<32x32xbf16, #tpu.memory_space<vmem>>, vector<32x32xbf16>
      %cst_47 = arith.constant dense<0.000000e+00> : vector<16x32xf32>
      %87 = tpu.matmul %85, %86, %cst_47 {dimension_numbers = #tpu.dot_dimension_numbers<[1], [0], [0], [1], [0, 0, 1, 1], [], []>} : vector<16x32xbf16>, vector<32x32xbf16>, vector<16x32xf32> -> vector<16x32xf32>
      %c0_48 = arith.constant 0 : index
      %c0_49 = arith.constant 0 : index
      %88 = vector.load %arg10[%c0_48, %c0_49] : memref<1x32xf32, #tpu.memory_space<vmem>>, vector<1x32xf32>
      %89 = vector.shape_cast %88 : vector<1x32xf32> to vector<32xf32>
      %90 = vector.shape_cast %89 : vector<32xf32> to vector<1x32xf32>
      %91 = vector.broadcast %90 : vector<1x32xf32> to vector<16x32xf32>
      %92 = arith.addf %87, %91 : vector<16x32xf32>
      %c0_50 = arith.constant 0 : index
      %c0_51 = arith.constant 0 : index
      %93 = vector.load %arg11[%c0_50, %c0_51] : memref<32x32xbf16, #tpu.memory_space<vmem>>, vector<32x32xbf16>
      %cst_52 = arith.constant dense<0.000000e+00> : vector<16x32xf32>
      %94 = tpu.matmul %82, %93, %cst_52 {dimension_numbers = #tpu.dot_dimension_numbers<[1], [0], [0], [1], [0, 0, 1, 1], [], []>} : vector<16x32xbf16>, vector<32x32xbf16>, vector<16x32xf32> -> vector<16x32xf32>
      %c0_53 = arith.constant 0 : index
      %c0_54 = arith.constant 0 : index
      %95 = vector.load %arg12[%c0_53, %c0_54] : memref<1x32xf32, #tpu.memory_space<vmem>>, vector<1x32xf32>
      %96 = vector.shape_cast %95 : vector<1x32xf32> to vector<32xf32>
      %97 = vector.shape_cast %96 : vector<32xf32> to vector<1x32xf32>
      %98 = vector.broadcast %97 : vector<1x32xf32> to vector<16x32xf32>
      %99 = arith.addf %94, %98 : vector<16x32xf32>
      %100 = vector.shape_cast %92 : vector<16x32xf32> to vector<16x4x8xf32>
      %101 = tpu.transpose %100, [1, 0, 2] : vector<16x4x8xf32> -> vector<4x16x8xf32>
      %102 = arith.truncf %101 : vector<4x16x8xf32> to vector<4x16x8xbf16>
      %c0_55 = arith.constant 0 : index
      %c0_56 = arith.constant 0 : index
      %c0_57 = arith.constant 0 : index
      %103 = vector.load %arg17[%c0_55, %c0_56, %c0_57] : memref<4x16x8xbf16, #tpu.memory_space<vmem>>, vector<4x16x8xbf16>
      tpu.vector_store %arg17[%c0_55, %c0_56, %c0_57], %102 {strides = array<i32>} : memref<4x16x8xbf16, #tpu.memory_space<vmem>>, vector<4x16x8xbf16>,
      %104 = vector.shape_cast %99 : vector<16x32xf32> to vector<16x4x8xf32>
      %105 = tpu.transpose %104, [1, 0, 2] : vector<16x4x8xf32> -> vector<4x16x8xf32>
      %106 = arith.truncf %105 : vector<4x16x8xf32> to vector<4x16x8xbf16>
      %c0_58 = arith.constant 0 : index
      %c0_59 = arith.constant 0 : index
      %c0_60 = arith.constant 0 : index
      %107 = vector.load %arg18[%c0_58, %c0_59, %c0_60] : memref<4x16x8xbf16, #tpu.memory_space<vmem>>, vector<4x16x8xbf16>
      tpu.vector_store %arg18[%c0_58, %c0_59, %c0_60], %106 {strides = array<i32>} : memref<4x16x8xbf16, #tpu.memory_space<vmem>>, vector<4x16x8xbf16>,
    } else {
    }
    %c8_i32 = arith.constant 8 : i32
    %3 = arith.muli %arg1, %c8_i32 : i32
    %4 = tpu.assume_multiple %3, 8 : i32
    %5 = arith.index_cast %4 : i32 to index
    %c0 = arith.constant 0 : index
    %6 = vector.load %arg16[%5, %c0] : memref<16x32xf32, #tpu.memory_space<vmem>>, vector<8x32xf32>
    %c0_1 = arith.constant 0 : index
    %7 = arith.index_cast %4 : i32 to index
    %c0_2 = arith.constant 0 : index
    %8 = vector.load %arg2[%c0_1, %7, %c0_2] : memref<1x16x32xf32, #tpu.memory_space<vmem>>, vector<1x8x32xf32>
    %9 = vector.shape_cast %8 : vector<1x8x32xf32> to vector<8x32xf32>
    %10 = arith.truncf %6 : vector<8x32xf32> to vector<8x32xbf16>
    %c0_3 = arith.constant 0 : index
    %c0_4 = arith.constant 0 : index
    %c0_5 = arith.constant 0 : index
    %11 = vector.load %arg4[%c0_3, %c0_4, %c0_5] : memref<1x8x32xbf16, #tpu.memory_space<vmem>>, vector<1x8x32xbf16>
    %12 = vector.shape_cast %11 : vector<1x8x32xbf16> to vector<8x32xbf16>
    %13 = arith.addf %10, %12 : vector<8x32xbf16>
    %c0_6 = arith.constant 0 : index
    %c0_7 = arith.constant 0 : index
    %14 = vector.load %arg7[%c0_6, %c0_7] : memref<32x32xbf16, #tpu.memory_space<vmem>>, vector<32x32xbf16>
    %cst = arith.constant dense<0.000000e+00> : vector<8x32xf32>
    %15 = tpu.matmul %13, %14, %cst {dimension_numbers = #tpu.dot_dimension_numbers<[1], [0], [0], [1], [0, 0, 1, 1], [], []>} : vector<8x32xbf16>, vector<32x32xbf16>, vector<8x32xf32> -> vector<8x32xf32>
    %c0_8 = arith.constant 0 : index
    %c0_9 = arith.constant 0 : index
    %16 = vector.load %arg8[%c0_8, %c0_9] : memref<1x32xf32, #tpu.memory_space<vmem>>, vector<1x32xf32>
    %17 = vector.shape_cast %16 : vector<1x32xf32> to vector<32xf32>
    %18 = vector.shape_cast %17 : vector<32xf32> to vector<1x32xf32>
    %19 = vector.broadcast %18 : vector<1x32xf32> to vector<8x32xf32>
    %20 = arith.addf %15, %19 : vector<8x32xf32>
    %21 = vector.shape_cast %20 : vector<8x32xf32> to vector<8x4x8xf32>
    %22 = tpu.transpose %21, [1, 0, 2] : vector<8x4x8xf32> -> vector<4x8x8xf32>
    %23 = arith.truncf %22 : vector<4x8x8xf32> to vector<4x8x8xbf16>
    %c0_10 = arith.constant 0 : index
    %c0_11 = arith.constant 0 : index
    %c0_12 = arith.constant 0 : index
    %24 = vector.load %arg17[%c0_10, %c0_11, %c0_12] : memref<4x16x8xbf16, #tpu.memory_space<vmem>>, vector<4x16x8xbf16>
    %c0_13 = arith.constant 0 : index
    %c0_14 = arith.constant 0 : index
    %c0_15 = arith.constant 0 : index
    %25 = vector.load %arg18[%c0_13, %c0_14, %c0_15] : memref<4x16x8xbf16, #tpu.memory_space<vmem>>, vector<4x16x8xbf16>
    "tpu.trace_start"() <{level = 10 : i32, message = "hqd,hkd->hqk"}> : () -> ()
    %cst_16 = arith.constant dense<0.000000e+00> : vector<4x8x16xf32>
    %26 = tpu.matmul %23, %24, %cst_16 {dimension_numbers = #tpu.dot_dimension_numbers<[2], [2], [1], [1], [0, 0, 0, 1, 1, 1], [0], [0]>} : vector<4x8x8xbf16>, vector<4x16x8xbf16>, vector<4x8x16xf32> -> vector<4x8x16xf32>
    "tpu.trace_stop"() : () -> ()
    %cst_17 = arith.constant dense<0xFF800000> : vector<4x8xf32>
    %27 = vector.multi_reduction <maximumf>, %26, %cst_17 [2] : vector<4x8x16xf32> to vector<4x8xf32>
    %28 = vector.shape_cast %27 : vector<4x8xf32> to vector<4x8x1xf32>
    %29 = vector.broadcast %28 : vector<4x8x1xf32> to vector<4x8x16xf32>
    %30 = arith.subf %26, %29 : vector<4x8x16xf32>
    %31 = math.exp %30 : vector<4x8x16xf32>
    %cst_18 = arith.constant dense<0.000000e+00> : vector<4x8xf32>
    %32 = vector.multi_reduction <add>, %31, %cst_18 [2] : vector<4x8x16xf32> to vector<4x8xf32>
    %33 = vector.shape_cast %32 : vector<4x8xf32> to vector<4x8x1xf32>
    %34 = tpu.reciprocal %33 {approx = true} : vector<4x8x1xf32> -> vector<4x8x1xf32>
    %35 = vector.broadcast %34 : vector<4x8x1xf32> to vector<4x8x16xf32>
    %36 = arith.mulf %31, %35 : vector<4x8x16xf32>
    %37 = arith.truncf %36 : vector<4x8x16xf32> to vector<4x8x16xbf16>
    "tpu.trace_start"() <{level = 10 : i32, message = "hqk,hkd->hqd"}> : () -> ()
    %cst_19 = arith.constant dense<0.000000e+00> : vector<4x8x8xf32>
    %38 = tpu.matmul %37, %25, %cst_19 {dimension_numbers = #tpu.dot_dimension_numbers<[2], [1], [1], [2], [0, 0, 0, 1, 1, 2], [0], [0]>} : vector<4x8x16xbf16>, vector<4x16x8xbf16>, vector<4x8x8xf32> -> vector<4x8x8xf32>
    "tpu.trace_stop"() : () -> ()
    %39 = tpu.transpose %38, [1, 0, 2] : vector<4x8x8xf32> -> vector<8x4x8xf32>
    %40 = vector.shape_cast %39 : vector<8x4x8xf32> to vector<8x32xf32>
    %41 = arith.truncf %40 : vector<8x32xf32> to vector<8x32xbf16>
    %c0_20 = arith.constant 0 : index
    %c0_21 = arith.constant 0 : index
    %42 = vector.load %arg13[%c0_20, %c0_21] : memref<32x32xbf16, #tpu.memory_space<vmem>>, vector<32x32xbf16>
    %cst_22 = arith.constant dense<0.000000e+00> : vector<8x32xf32>
    %43 = tpu.matmul %41, %42, %cst_22 {dimension_numbers = #tpu.dot_dimension_numbers<[1], [0], [0], [1], [0, 0, 1, 1], [], []>} : vector<8x32xbf16>, vector<32x32xbf16>, vector<8x32xf32> -> vector<8x32xf32>
    %c0_23 = arith.constant 0 : index
    %c0_24 = arith.constant 0 : index
    %44 = vector.load %arg14[%c0_23, %c0_24] : memref<1x32xf32, #tpu.memory_space<vmem>>, vector<1x32xf32>
    %45 = vector.shape_cast %44 : vector<1x32xf32> to vector<32xf32>
    %46 = vector.shape_cast %45 : vector<32xf32> to vector<1x32xf32>
    %47 = vector.broadcast %46 : vector<1x32xf32> to vector<8x32xf32>
    %48 = arith.addf %43, %47 : vector<8x32xf32>
    %49 = arith.addf %9, %48 : vector<8x32xf32>
    %c0_25 = arith.constant 0 : index
    %c0_26 = arith.constant 0 : index
    %c0_27 = arith.constant 0 : index
    %50 = vector.load %arg15[%c0_25, %c0_26, %c0_27] : memref<1x8x32xf32, #tpu.memory_space<vmem>>, vector<1x8x32xf32>
    %51 = vector.shape_cast %50 : vector<1x8x32xf32> to vector<8x32xf32>
    %52 = vector.shape_cast %49 : vector<8x32xf32> to vector<1x8x32xf32>
    tpu.vector_store %arg15[%c0_25, %c0_26, %c0_27], %52 {strides = array<i32>} : memref<1x8x32xf32, #tpu.memory_space<vmem>>, vector<1x8x32xf32>,
    return
  }
  func.func @transform_0(%arg0: i32, %arg1: i32) -> (i32, i32, i32) {
    %c0_i32 = arith.constant 0 : i32
    %c0_i32_0 = arith.constant 0 : i32
    %c0_i32_1 = arith.constant 0 : i32
    return %arg0, %c0_i32, %c0_i32_0 : i32, i32, i32
  }
  func.func @transform_1(%arg0: i32, %arg1: i32) -> (i32, i32, i32) {
    %c0_i32 = arith.constant 0 : i32
    %c0_i32_0 = arith.constant 0 : i32
    %c0_i32_1 = arith.constant 0 : i32
    return %arg0, %c0_i32, %c0_i32_0 : i32, i32, i32
  }
  func.func @transform_2(%arg0: i32, %arg1: i32) -> (i32, i32, i32) {
    %c0_i32 = arith.constant 0 : i32
    %c0_i32_0 = arith.constant 0 : i32
    return %arg0, %arg1, %c0_i32 : i32, i32, i32
  }
  func.func @transform_3(%arg0: i32, %arg1: i32) -> (i32, i32) {
    %c0_i32 = arith.constant 0 : i32
    %c0_i32_0 = arith.constant 0 : i32
    %c0_i32_1 = arith.constant 0 : i32
    return %c0_i32, %c0_i32_0 : i32, i32
  }
  func.func @transform_4(%arg0: i32, %arg1: i32) -> (i32, i32) {
    %c0_i32 = arith.constant 0 : i32
    %c0_i32_0 = arith.constant 0 : i32
    %c0_i32_1 = arith.constant 0 : i32
    return %c0_i32, %c0_i32_0 : i32, i32
  }
  func.func @transform_5(%arg0: i32, %arg1: i32) -> (i32, i32) {
    %c0_i32 = arith.constant 0 : i32
    %c0_i32_0 = arith.constant 0 : i32
    %c0_i32_1 = arith.constant 0 : i32
    return %c0_i32, %c0_i32_0 : i32, i32
  }
  func.func @transform_6(%arg0: i32, %arg1: i32) -> (i32, i32) {
    %c0_i32 = arith.constant 0 : i32
    %c0_i32_0 = arith.constant 0 : i32
    %c0_i32_1 = arith.constant 0 : i32
    return %c0_i32, %c0_i32_0 : i32, i32
  }
  func.func @transform_7(%arg0: i32, %arg1: i32) -> (i32, i32) {
    %c0_i32 = arith.constant 0 : i32
    %c0_i32_0 = arith.constant 0 : i32
    %c0_i32_1 = arith.constant 0 : i32
    return %c0_i32, %c0_i32_0 : i32, i32
  }
  func.func @transform_8(%arg0: i32, %arg1: i32) -> (i32, i32) {
    %c0_i32 = arith.constant 0 : i32
    %c0_i32_0 = arith.constant 0 : i32
    %c0_i32_1 = arith.constant 0 : i32
    return %c0_i32, %c0_i32_0 : i32, i32
  }
  func.func @transform_9(%arg0: i32, %arg1: i32) -> (i32, i32) {
    %c0_i32 = arith.constant 0 : i32
    %c0_i32_0 = arith.constant 0 : i32
    %c0_i32_1 = arith.constant 0 : i32
    return %c0_i32, %c0_i32_0 : i32, i32
  }
  func.func @transform_10(%arg0: i32, %arg1: i32) -> (i32, i32) {
    %c0_i32 = arith.constant 0 : i32
    %c0_i32_0 = arith.constant 0 : i32
    %c0_i32_1 = arith.constant 0 : i32
    return %c0_i32, %c0_i32_0 : i32, i32
  }
  func.func @transform_11(%arg0: i32, %arg1: i32) -> (i32, i32) {
    %c0_i32 = arith.constant 0 : i32
    %c0_i32_0 = arith.constant 0 : i32
    %c0_i32_1 = arith.constant 0 : i32
    return %c0_i32, %c0_i32_0 : i32, i32
  }
  func.func @transform_12(%arg0: i32, %arg1: i32) -> (i32, i32) {
    %c0_i32 = arith.constant 0 : i32
    %c0_i32_0 = arith.constant 0 : i32
    %c0_i32_1 = arith.constant 0 : i32
    return %c0_i32, %c0_i32_0 : i32, i32
  }
  func.func @transform_13(%arg0: i32, %arg1: i32) -> (i32, i32, i32) {
    %c0_i32 = arith.constant 0 : i32
    %c0_i32_0 = arith.constant 0 : i32
    return %arg0, %arg1, %c0_i32 : i32, i32, i32
  }
}

</mosaic_0001>

<bundles_post_ra>
// kernel: tpu_custom_call.1
= control target key start
LH: loop header
LB: loop body
LE: loop exit
PB: predicated region body
PF: predicated region fallthrough
CT: control target
= control target key end

     0   :  { %s4240_s0 = inlined_call_operand.hbm [shape: f32[2,16,32], index: 0, kind: input, shape index: {}]   ;;  %s4241_s1 = inlined_call_operand.hbm [shape: bf16[2,16,32], index: 1, kind: input, shape index: {}]   ;;  %s4242_s2 = inlined_call_operand.hbm [shape: bf16[2,16,32], index: 2, kind: input, shape index: {}]   ;;  %s4243_s3 = inlined_call_operand.hbm [shape: f32[1,32], index: 3, kind: input, shape index: {}]   ;;  %s4244_s4 = inlined_call_operand.hbm [shape: f32[1,32], index: 4, kind: input, shape index: {}]   ;;  %s4245_s5 = inlined_call_operand.hbm [shape: bf16[32,32], index: 5, kind: input, shape index: {}]   ;;  %s4246_s6 = inlined_call_operand.hbm [shape: f32[1,32], index: 6, kind: input, shape index: {}]   ;;  %s4247_s7 = inlined_call_operand.hbm [shape: bf16[32,32], index: 7, kind: input, shape index: {}]   ;;  %s4248_s8 = inlined_call_operand.hbm [shape: f32[1,32], index: 8, kind: input, shape index: {}]   ;;  %s4249_s9 = inlined_call_operand.vmem [shape: bf16[32,32], index: 9, kind: input, shape index: {}]   ;;  %s4250_s10 = inlined_call_operand.vmem [shape: f32[1,32], index: 10, kind: input, shape index: {}]   ;;  %s4251_s11 = inlined_call_operand.hbm [shape: bf16[32,32], index: 11, kind: input, shape index: {}]   ;;  %s4252_s12 = inlined_call_operand.vmem [shape: f32[1,32], index: 12, kind: input, shape index: {}]   ;;  %s4253_s13 = inlined_call_operand.hbm [shape: f32[2,16,32], index: 13, kind: output, shape index: {}]  }
   0x1   :  { %4275 = sst [smem:[#allocation38_spill]] %s4240_s0 }
   0x2   :  { %4276 = sst [smem:[#allocation39_spill]] %s4241_s1 }
   0x3   :  { %4277 = sst [smem:[#allocation40_spill]] %s4242_s2 }
   0x4   :  { %4278 = sst [smem:[#allocation41_spill]] %s4243_s3 }
   0x5   :  { %4279 = sst [smem:[#allocation42_spill]] %s4244_s4 }
   0x6   :  { %4280 = sst [smem:[#allocation43_spill]] %s4245_s5 }
   0x7   :  { %4281 = sst [smem:[#allocation44_spill]] %s4246_s6 }
   0x8   :  { %4282 = sst [smem:[#allocation45_spill]] %s4247_s7 }
   0x9   :  { %4283 = sst [smem:[#allocation46_spill]] %s4248_s8 }
   0xa   :  { %4284 = sst [smem:[#allocation47_spill]] %s4249_s9 }
   0xb   :  { %4285 = sst [smem:[#allocation48_spill]] %s4250_s10 }
   0xc   :  { %4286 = sst [smem:[#allocation49_spill]] %s4251_s11 }
   0xd   :  { %4287 = sst [smem:[#allocation50_spill]] %s4252_s12 }
   0xe   :  { %4288 = sst [smem:[#allocation51_spill]] %s4253_s13 }
   0xf   :  { %18 = vsyncpa [#allocation6], 0 }
  0x10   :  { %20 = vsyncpa [#allocation6 + $0x1], 0 }
  0x11   :  { %21 = vsyncpa [#allocation9], 0 }
  0x12   :  { %23 = vsyncpa [#allocation9 + $0x1], 0 }
  0x13   :  { %24 = vsyncpa [#allocation12], 0 }
  0x14   :  { %25 = vsyncpa [#allocation15], 0 }
  0x15   :  { %26 = vsyncpa [#allocation18], 0 }
  0x16   :  { %27 = vsyncpa [#allocation21], 0 }
  0x17   :  { %28 = vsyncpa [#allocation7], 0 }
  0x18   :  { %30 = vsyncpa [#allocation7 + $0x1], 0  ;;  %s3619_s25 = smov 0   ;;  %s3621_s26 = smov 0  }
  0x19   :  { %s3623_s27 = smov 0   ;;  %s3625_s28 = smov 0  }
  0x1a   :  { %s3627_s29 = smov 0   ;;  %s3629_s30 = smov 0  }
  0x1b   :  { %s3631_s14 = smov 0   ;;  %s3633_s15 = smov 0  }
  0x1c   :  { %s3635_s16 = smov 0   ;;  %s3637_s17 = smov 0  }
  0x1d   :  { %s3639_s18 = smov 0  }
  0x1e LB: > { %4289 = sst [smem:[#allocation31_spill]] %s3491_s29  ;;  %s3675_s19 = sadd.s32 4294967295, %s3515_s18   ;;  %s3515_s18 = sphi %s3639_s18, %s36_s18   ;;  %s3511_s17 = sphi %s3637_s17, %s4356_s17   ;;  %s3507_s16 = sphi %s3635_s16, %s4355_s16   ;;  %s3503_s15 = sphi %s3633_s15, %s4354_s15   ;;  %s3499_s14 = sphi %s3631_s14, %s4353_s14   ;;  %s3495_s30 = sphi %s3629_s30, %s4352_s30   ;;  %s3491_s29 = sphi %s3627_s29, %s4351_s29   ;;  %s3487_s28 = sphi %s3625_s28, %s4345_s28   ;;  %s3483_s27 = sphi %s3623_s27, %s4350_s27   ;;  %s3479_s26 = sphi %s3621_s26, %s4349_s26   ;;  %s3475_s25 = sphi %s3619_s25, %s4348_s25  }
  0x1f   : > { %4290 = sst [smem:[#allocation32_spill]] %s3499_s14  ;;  %p2638_p0 = scmp.ge.s32.totalorder %s3515_s18, 1 }
  0x20   : > { %4291 = sst [smem:[#allocation33_spill]] %s3503_s15  ;;  %p4266_p1 = scmp.eq.s32.totalorder %s3675_s19, 0 }
  0x21   : > { %p371_p2 = scmp.lt.s32.totalorder %s3515_s18, 5  ;;  %s3517_s21 = smov [#allocation11]  }
  0x22   : > { %s384_s22 = sshll.u32 %s3517_s21, 4  ;;  %s3518_s23 = smov [#allocation14]   ;;  %s385_s22 = int_to_ptr.vmem [resolvable:$true] %s384_s22 }
  0x23   : > { %p3680_p3 = pnand %p2638_p0, %p371_p2  ;;  %s405_s24 = sshll.u32 %s3518_s23, 4  ;;  %s3692_s24 = int_to_ptr.vmem [resolvable:$true] %s405_s24 }
  0x24   : > { %s3519_s12 = smov [#allocation17]   ;;  %s3116_s21 = scalar_lea.vmem %s385_s22, 16 }
  0x25   : > { %s4292_s20 = scalar_select %p3680_p3, 1, 0 }
  0x26   : > { %p2900_p4 = pneg %p3680_p3  ;;  %s429_s15 = sshll.u32 %s3519_s12, 4  ;;  %s430_s15 = int_to_ptr.vmem [resolvable:$true] %s429_s15 }
  0x27   : > { %4293 = sst [smem:[#allocation34_spill]] %s4292_s20  ;;  %p3117_p7 = scmp.ne.s32.totalorder %s385_s22, %s3116_s21 }
  0x28   : > { %p3688_p5 = pnand %p2900_p4, %p4266_p1  ;;  %s3123_s23 = scalar_lea.vmem %s385_s22, 32 }
  0x29   : > { %p3124_p10 = scmp.lt.s32.totalorder %s385_s22, %s385_s22  ;;  %p3125_p11 = scmp.lt.s32.totalorder %s3123_s23, %s3116_s21 }
  0x2a   : > { %p3696_p6 = pneg %p3688_p5 }
  0x2b   : > { %p3126_p12 = por %p3125_p11, %p3124_p10 }
  0x2c   : > { %p3119_p8 = pnand %p3117_p7, %p3696_p6 }
  0x2e   : > { %p3120_p9 = pneg %p3119_p8 }
  0x30   : > { %p3127_p13 = pnand %p3126_p12, %p3120_p9 }
  0x32   : > { %3130 = shalt.err (!%p3127_p13)
}
  0x33   : > { %s4296_s3 = sld [smem:[#allocation41_spill]]  ;;  %s3142_s14 = scalar_lea.vmem %s3692_s24, 256 }
  0x34   : > { %p3143_p0 = scmp.ne.s32.totalorder %s3692_s24, %s3142_s14  ;;  %p3150_p7 = scmp.lt.s32.totalorder %s3692_s24, %s3692_s24 }
  0x35   : > { %p3151_p8 = scmp.lt.s32.totalorder %s3142_s14, %s3142_s14 }
  0x36   : > { %p3145_p2 = pnand %p3143_p0, %p3696_p6 }
  0x37   : > { %p3152_p9 = por %p3151_p8, %p3150_p7 }
  0x38   : > { %p3146_p4 = pneg %p3145_p2 }
  0x39   : > { %2903 = dma.hbm_to_vmem [thread:$0]  (!%p3688_p5), %s4296_s3, 16, %s385_s22, [#allocation12]  }
  0x3a   : > { %p3153_p10 = pnand %p3152_p9, %p3146_p4 }
  0x3c   : > { %3156 = shalt.err (!%p3153_p10)
}
  0x3d   : > { %s4257_s21 = smov 64   ;;  %s4259_s9 = smov 4  }
  0x3e   : > { %s4297_s5 = sld [smem:[#allocation43_spill]]  ;;  %s3168_s12 = scalar_lea.vmem %s430_s15, 256 }
  0x3f   : > { %p3169_p11 = scmp.ne.s32.totalorder %s430_s15, %s3168_s12  ;;  %p3176_p0 = scmp.lt.s32.totalorder %s430_s15, %s430_s15 }
  0x40   : > { %p3177_p2 = scmp.lt.s32.totalorder %s3168_s12, %s3168_s12 }
  0x41   : > { %p3171_p12 = pnand %p3169_p11, %p3696_p6 }
  0x42   : > { %p3178_p4 = por %p3177_p2, %p3176_p0 }
  0x43   : > { %p3172_p13 = pneg %p3171_p12 }
  0x44   : > { %2909 = dma.hbm_to_vmem [thread:$0]  (!%p3688_p5), %s4297_s5, 256, %s3692_s24, [#allocation15], %s4257_s21, %s4257_s21, %s4259_s9  }
  0x45   : > { %p3179_p7 = pnand %p3178_p4, %p3172_p13 }
  0x47   : > { %3182 = shalt.err (!%p3179_p7)
}
  0x48   : > { %s4298_s7 = sld [smem:[#allocation45_spill]]  ;;  %p62_p8 = scmp.ne.s32.totalorder %s3495_s30, %s3491_s29 }
  0x49   : > { %p4267_p9 = scmp.eq.s32.totalorder %s3515_s18, 0  ;;  %p68_p10 = scmp.ne.s32.totalorder %s3491_s29, %s3487_s28 }
  0x4a   : > { %p4265_p11 = scmp.lt.s32.totalorder %s3515_s18, 4  ;;  %s3742_s3 = sand.u32 1, %s3495_s30  }
  0x4b   : > { %p64_p12 = por %p4267_p9, %p62_p8  ;;  %p3746_p13 = por %p4266_p1, %p68_p10 }
  0x4c   : > { %s497_s23 = sand.u32 1, %s3515_s18   ;;  %s2650_s28 = sshll.u32 %s3742_s3, 3 }
  0x4d   : > { %s4299_s22 = scalar_select %p3746_p13, 1, 0 }
  0x4e   : > { %2915 = dma.hbm_to_vmem [thread:$0]  (!%p3688_p5), %s4298_s7, 256, %s430_s15, [#allocation18], %s4257_s21, %s4257_s21, %s4259_s9  }
  0x4f   : > { %4300 = sst [smem:[#allocation35_spill]] %s4299_s22  ;;  %p3753_p0 = pnand %p4265_p11, %p64_p12 }
  0x50   : > { %s2739_s15 = sshll.u32 %s3511_s17, 7  ;;  %s4302_s1 = sld [smem:[#allocation39_spill]] }
  0x51   : > { %s4301_s12 = scalar_select %p3753_p0, 1, 0 }
  0x52   : > { %s501_s9 = scalar_lea.vmem [#allocation8], %s2650_s28  ;;  %s3762_s7 = scalar_lea.sflag [#allocation9], %s497_s23 }
  0x53   : > { %s508_s5 = sshll.u32 %s501_s9, 4  ;;  %p4268_p2 = pneg %p3753_p0  ;;  %s509_s5 = int_to_ptr.vmem [resolvable:$true] %s508_s5 }
  0x54   : > { %s3196_s22 = scalar_lea.vmem %s509_s5, 128  ;;  %s3522_s29 = smov [#allocation8]  }
  0x55   : > { %p3197_p4 = scmp.ne.s32.totalorder %s509_s5, %s3196_s22  ;;  %s3201_s20 = sshll.u32 %s3522_s29, 4  ;;  %s3202_s20 = int_to_ptr.vmem [resolvable:$false] %s3201_s20 }
  0x56   : > { %s507_s21 = scalar_lea.hbm %s4302_s1, %s2739_s15  ;;  %s3203_s2 = scalar_lea.vmem %s3202_s20, 256 }
  0x57   : > { %p3199_p7 = pnand %p3197_p4, %p4268_p2  ;;  %p3204_p10 = scmp.lt.s32.totalorder %s509_s5, %s3202_s20 }
  0x58   : > { %p3205_p12 = scmp.lt.s32.totalorder %s3203_s2, %s3196_s22 }
  0x59   : > { %p3200_p8 = pneg %p3199_p7 }
  0x5a   : > { %p3206_p11 = por %p3205_p12, %p3204_p10 }
  0x5c   : > { %p3207_p1 = pnand %p3206_p11, %p3200_p8 }
  0x5e   : > { %3210 = shalt.err (!%p3207_p1)
}
  0x5f   : > { %s4303_s9 = smov 4   ;;  %s4304_s24 = smov 64  }
  0x60   : > { %2928 = dma.hbm_to_vmem [thread:$0]  (!%p3753_p0), %s507_s21, 128, %s509_s5, %s3762_s7, %s4304_s24, %s4304_s24, %s4303_s9  }
  0x61   : > { %s3523_s23 = smov [#allocation13]   ;;  %s3524_s15 = smov [#allocation16]  }
  0x62   : > { %s395_s28 = sshll.u32 %s3523_s23, 4  ;;  %s419_s29 = sshll.u32 %s3524_s15, 4  ;;  %s396_s28 = int_to_ptr.vmem [resolvable:$true] %s395_s28  ;;  %s420_s29 = int_to_ptr.vmem [resolvable:$true] %s419_s29 }
  0x63   : > { %s3222_s14 = scalar_lea.vmem %s396_s28, 16  ;;  %s3229_s2 = scalar_lea.vmem %s396_s28, 32 }
  0x64   : > { %p3223_p4 = scmp.ne.s32.totalorder %s396_s28, %s3222_s14  ;;  %p3230_p1 = scmp.lt.s32.totalorder %s396_s28, %s396_s28 }
  0x65   : > { %p3231_p11 = scmp.lt.s32.totalorder %s3229_s2, %s3222_s14 }
  0x66   : > { %p3225_p7 = pnand %p3223_p4, %p3696_p6 }
  0x67   : > { %p3232_p8 = por %p3231_p11, %p3230_p1 }
  0x68   : > { %p3226_p10 = pneg %p3225_p7 }
  0x6a   : > { %p3233_p12 = pnand %p3232_p8, %p3226_p10 }
  0x6c   : > { %3236 = shalt.err (!%p3233_p12)
}
  0x6d   : > { %s4305_s4 = sld [smem:[#allocation42_spill]]  ;;  %s3248_s21 = scalar_lea.vmem %s420_s29, 16 }
  0x6e   : > { %p3249_p9 = scmp.ne.s32.totalorder %s420_s29, %s3248_s21  ;;  %s3255_s22 = scalar_lea.vmem %s420_s29, 32 }
  0x6f   : > { %p3256_p7 = scmp.lt.s32.totalorder %s420_s29, %s420_s29  ;;  %p3257_p13 = scmp.lt.s32.totalorder %s3255_s22, %s3248_s21 }
  0x70   : > { %p3251_p2 = pnand %p3249_p9, %p3696_p6 }
  0x71   : > { %p3258_p3 = por %p3257_p13, %p3256_p7 }
  0x72   : > { %p3252_p4 = pneg %p3251_p2 }
  0x73   : > { %2906 = dma.hbm_to_vmem [thread:$0]  (!%p3688_p5), %s4305_s4, 16, %s396_s28, [#allocation12]  }
  0x74   : > { %p3259_p1 = pnand %p3258_p3, %p3252_p4 }
  0x76   : > { %3262 = shalt.err (!%p3259_p1)
}
  0x77   : > { %s4306_s6 = sld [smem:[#allocation44_spill]]  ;;  %s3525_s28 = smov [#allocation19]  }
  0x78   : > { %s443_s14 = sshll.u32 %s3525_s28, 4  ;;  %s3526_s2 = smov [#allocation20]   ;;  %s444_s14 = int_to_ptr.vmem [resolvable:$true] %s443_s14 }
  0x79   : > { %s459_s20 = sshll.u32 %s3526_s2, 4  ;;  %s3274_s5 = scalar_lea.vmem %s444_s14, 16  ;;  %s460_s20 = int_to_ptr.vmem [resolvable:$true] %s459_s20 }
  0x7a   : > { %p3275_p9 = scmp.ne.s32.totalorder %s444_s14, %s3274_s5  ;;  %s3281_s21 = scalar_lea.vmem %s444_s14, 32 }
  0x7b   : > { %p3282_p3 = scmp.lt.s32.totalorder %s444_s14, %s444_s14  ;;  %p3283_p13 = scmp.lt.s32.totalorder %s3281_s21, %s3274_s5 }
  0x7c   : > { %p3277_p2 = pnand %p3275_p9, %p3696_p6 }
  0x7d   : > { %2912 = dma.hbm_to_vmem [thread:$0]  (!%p3688_p5), %s4306_s6, 16, %s420_s29, [#allocation15]  }
  0x7e   : > { %p3278_p10 = pneg %p3277_p2  ;;  %p3284_p11 = por %p3283_p13, %p3282_p3 }
  0x80   : > { %p3285_p8 = pnand %p3284_p11, %p3278_p10 }
  0x82   : > { %3288 = shalt.err (!%p3285_p8)
}
  0x83   : > { %s4307_s8 = sld [smem:[#allocation46_spill]]  ;;  %s3300_s23 = scalar_lea.vmem %s460_s20, 256 }
  0x84   : > { %p3301_p12 = scmp.ne.s32.totalorder %s460_s20, %s3300_s23  ;;  %p3308_p1 = scmp.lt.s32.totalorder %s460_s20, %s460_s20 }
  0x85   : > { %p3309_p9 = scmp.lt.s32.totalorder %s3300_s23, %s3300_s23 }
  0x86   : > { %p3303_p4 = pnand %p3301_p12, %p3696_p6 }
  0x87   : > { %p3310_p2 = por %p3309_p9, %p3308_p1 }
  0x88   : > { %p3304_p7 = pneg %p3303_p4 }
  0x89   : > { %2918 = dma.hbm_to_vmem [thread:$0]  (!%p3688_p5), %s4307_s8, 16, %s444_s14, [#allocation18]  }
  0x8a   : > { %p3311_p0 = pnand %p3310_p2, %p3304_p7 }
  0x8c   : > { %3314 = shalt.err (!%p3311_p0)
}
  0x8d   : > { %s4308_s11 = sld [smem:[#allocation49_spill]]  ;;  %s2647_s10 = sshll.u32 %s3742_s3, 4 }
  0x8e   : > { %s2738_s14 = sshll.u32 %s3511_s17, 8  ;;  %s4309_s0 = sld [smem:[#allocation38_spill]] }
  0x8f   : > { %s480_s22 = scalar_lea.vmem [#allocation5], %s2647_s10  ;;  %s477_s13 = scalar_lea.sflag [#allocation6], %s3742_s3 }
  0x90   : > { %s487_s29 = sshll.u32 %s480_s22, 4  ;;  %p4310_p0 = scmp.ne.s32.totalorder %s4301_s12, 0  ;;  %s488_s29 = int_to_ptr.vmem [resolvable:$true] %s487_s29 }
  0x91   : > { %s3328_s23 = scalar_lea.vmem %s488_s29, 256  ;;  %s3527_s15 = smov [#allocation5]  }
  0x92   : > { %p3329_p6 = scmp.ne.s32.totalorder %s488_s29, %s3328_s23  ;;  %p4311_p10 = pneg %p4310_p0 }
  0x93   : > { %2921 = dma.hbm_to_vmem [thread:$0]  (!%p3688_p5), %s4308_s11, 256, %s460_s20, [#allocation21], %s4304_s24, %s4304_s24, %s4303_s9  }
  0x94   : > { %s486_s21 = scalar_lea.hbm %s4309_s0, %s2738_s14  ;;  %p3331_p3 = pnand %p3329_p6, %p4311_p10 }
  0x95   : > { %s3333_s28 = sshll.u32 %s3527_s15, 4  ;;  %s3334_s28 = int_to_ptr.vmem [resolvable:$false] %s3333_s28 }
  0x96   : > { %p3332_p13 = pneg %p3331_p3  ;;  %s3335_s9 = scalar_lea.vmem %s3334_s28, 512 }
  0x97   : > { %p3336_p5 = scmp.lt.s32.totalorder %s488_s29, %s3334_s28  ;;  %p3337_p11 = scmp.lt.s32.totalorder %s3335_s9, %s3328_s23 }
  0x99   : > { %p3338_p8 = por %p3337_p11, %p3336_p5 }
  0x9b   : > { %p3339_p12 = pnand %p3338_p8, %p3332_p13 }
  0x9d   : > { %3342 = shalt.err (!%p3339_p12)
}
  0x9e   : > { %s3528_s24 = smov 128   ;;  %s3529_s3 = smov 8  }
  0x9f   : > { %2925 = dma.hbm_to_vmem [thread:$0]  (!%p4310_p0), %s486_s21, 256, %s488_s29, %s477_s13, %s3528_s24, %s3528_s24, %s3529_s3  }
  0xa0   : > { %s2637_s20 = sadd.s32 4294967294, %s3515_s18   ;;  %s45_s10 = sadd.s32 1, %s3507_s16 }
  0xa1   : > { %p46_p4 = scmp.ge.s32.totalorder %s45_s10, 2  ;;  %s48_s14 = sadd.s32 1, %s3511_s17 }
  0xa2   : > { %s109_s2 = sadd.s32 1, %s3483_s27  ;;  %p116_p7 = scmp.ne.s32.totalorder %s3483_s27, %s3479_s26 }
  0xa3   : > { %s4358_s10 = smov (%p46_p4, %s45_s10), 0  ;;  %s4360_s14 = smov (!%p46_p4, %s48_s14), %s3511_s17 }
  0xa4   : > { %4312 = sst [smem:[#allocation36_spill]] %s4358_s10  ;;  %s105_s5 = ssub.s32 %s3507_s16, %s4358_s10 }
  0xa5   : > { %p4313_p1 = scmp.eq.s32.totalorder %s3515_s18, 0  ;;  %p50_p2 = scmp.ge.s32.totalorder %s4360_s14, 2 }
  0xa6   : > { %p122_p6 = scmp.ne.s32.totalorder %s3479_s26, %s3475_s25  ;;  %p358_p0 = scmp.eq.s32.totalorder %s3675_s19, 3 }
  0xa7   : > { %p3830_p9 = por %p116_p7, %p4313_p1  ;;  %p364_p10 = scmp.eq.s32.totalorder %s2637_s20, 3 }
  0xa8   : > { %s4362_s14 = smov (%p50_p2, %s4360_s14), 0  ;;  %p4316_p3 = scmp.eq.s32.totalorder %s3675_s19, 0 }
  0xa9   : > { %4315 = sst [smem:[#allocation37_spill]] %s4362_s14  ;;  %p3845_p5 = por %p358_p0, %p116_p7 }
  0xaa   : > { %p3841_p13 = por %p122_p6, %p4316_p3  ;;  %s52_s29 = ssub.s32 %s3511_s17, %s4362_s14 }
  0xab   : > { %p3851_p11 = por %p364_p10, %p122_p6  ;;  %p53_p8 = scmp.eq.s32.totalorder %s52_s29, 0 }
  0xac   : > { %s106_s23 = sor.u32 %s105_s5, %s52_s29  ;;  %s520_s15 = sand.u32 1, %s3483_s27  }
  0xad   : > { %p107_p12 = scmp.eq.s32.totalorder %s106_s23, 0  ;;  %s4320_s28 = sadd.s32 1, %s3495_s30 }
  0xae   : > { %s3859_s9 = scalar_select %p53_p8, %s3495_s30, %s4320_s28  }
  0xaf   : > { %s3862_s24 = scalar_select %p107_p12, %s3483_s27, %s109_s2  }
  0xb0   : > { %s2653_s3 = sshll.u32 %s520_s15, 2  ;;  %s2654_s20 = sshll.u32 %s3511_s17, 1 }
  0xb1   : > { %s527_s0 = sadd.s32 %s3507_s16, %s2654_s20  ;;  %s522_s4 = scalar_lea.vmem [#allocation10], %s2653_s3 }
  0xb2   : > { %s2655_s1 = sshll.u32 %s527_s0, 6  ;;  %s531_s6 = sshll.u32 %s522_s4, 4  ;;  %s532_s6 = int_to_ptr.vmem [resolvable:$true] %s531_s6 }
  0xb3   : > { %s4321_s14 = sld [smem:[#allocation40_spill]]  ;;  %p4322_p4 = scmp.lt.s32.totalorder %s3515_s18, 4 }
  0xb4   : > { %s3356_s2 = scalar_lea.vmem %s532_s6, 64  ;;  %s3530_s0 = smov [#allocation10]  }
  0xb5   : > { %p3873_p7 = pnand %p4322_p4, %p3830_p9  ;;  %p3357_p2 = scmp.ne.s32.totalorder %s532_s6, %s3356_s2 }
  0xb6   : > { %s3361_s4 = sshll.u32 %s3530_s0, 4  ;;  %s3362_s4 = int_to_ptr.vmem [resolvable:$false] %s3361_s4 }
  0xb7   : > { %p3345_p1 = pneg %p3873_p7  ;;  %s3363_s29 = scalar_lea.vmem %s3362_s4, 128 }
  0xb8   : > { %p3364_p10 = scmp.lt.s32.totalorder %s532_s6, %s3362_s4  ;;  %p3365_p3 = scmp.lt.s32.totalorder %s3363_s29, %s3356_s2 }
  0xb9   : > { %s529_s10 = scalar_lea.hbm %s4321_s14, %s2655_s1  ;;  %p3359_p6 = pnand %p3357_p2, %p3345_p1 }
  0xba   : > { %p3366_p8 = por %p3365_p3, %p3364_p10 }
  0xbb   : > { %p3360_p0 = pneg %p3359_p6 }
  0xbd   : > { %p3367_p12 = pnand %p3366_p8, %p3360_p0 }
  0xbf   : > { %3370 = shalt.err (!%p3367_p12)
}
  0xc0   : > { %2931 = dma.hbm_to_vmem [thread:$0]  (!%p3873_p7), %s529_s10, 64, %s532_s6, %s3762_s7  }
  0xc1   : > { %s4324_s1 = sld [smem:[#allocation34_spill]] }
  0xc7   : > { %p4325_p9 = scmp.ne.s32.totalorder %s4324_s1, 0 }
  0xc8   : > { %s4326_s8 = sld [smem:[#allocation31_spill]] (!%p4325_p9) }
  0xc9   : > { %540 = sbr.rel (%p4325_p9) target bundleno = 2334 (0x91e), region = 72  ;;  %s4327_s11 = sld [smem:[#allocation35_spill]] (!%p4325_p9) }
  0xce   : > { %s542_s14 = sand.u32 1, %s4326_s8  }
  0xcf   : > { %s2657_s12 = sshll.u32 %s542_s14, 4  ;;  %s543_s23 = scalar_lea.sflag [#allocation6], %s542_s14 }
  0xd0   : > { %s3885_s15 = scalar_lea.vmem [#allocation5], %s2657_s12  ;;  %p4328_p4 = scmp.ne.s32.totalorder %s4327_s11, 0 }
  0xd2   : > { %3442 = dma.done.wait (%p4328_p4), %s543_s23, 256  }
  0xd3   : > { %3444 = vsyncadd (%p4328_p4), %s543_s23, 4294967040  ;;  %s551_s28 = sand.u32 1, %s3675_s19   ;;  %s2658_s3 = sshll.u32 %s542_s14, 3 }
  0xd4   : > { %s552_s6 = scalar_lea.sflag [#allocation9], %s551_s28  ;;  %s3892_s7 = scalar_lea.vmem [#allocation8], %s2658_s3 }
  0xd5   : > { %3446 = dma.done.wait (%p4328_p4), %s552_s6, 128  }
  0xd6   : > { %3448 = vsyncadd (%p4328_p4), %s552_s6, 4294967168  ;;  %s3899_s10 = sand.u32 1, %s3479_s26  }
  0xd7   : > { %s2659_s20 = sshll.u32 %s3899_s10, 2 }
  0xd8   : > { %s3902_s5 = scalar_lea.vmem [#allocation10], %s2659_s20 }
  0xd9   : > { %3450 = dma.done.wait (%p3841_p13), %s552_s6, 64  }
  0xda   : > { %3452 = vsyncadd (%p3841_p13), %s552_s6, 4294967232  ;;  %p4329_p7 = scmp.eq.s32.totalorder %s3675_s19, 0 }
  0xdc   : > { %3454 = dma.done.wait (%p4329_p7), [#allocation12], 32   ;;  %p4330_p1 = pmov %p4329_p7 }
  0xde   : > { %3456 = vsyncadd (%p4330_p1), [#allocation12], 4294967264  ;;  %p4331_p2 = pmov %p4330_p1 }
  0xdf   : > { %p4332_p6 = pmov %p4330_p1 }
  0xe0   : > { %3458 = dma.done.wait (%p4331_p2), [#allocation15], 272  }
  0xe1   : > { %3460 = vsyncadd (%p4332_p6), [#allocation15], 4294967024  ;;  %p4333_p0 = pmov %p4330_p1 }
  0xe3   : > { %3462 = dma.done.wait (%p4333_p0), [#allocation18], 272   ;;  %p4334_p10 = pmov %p4333_p0 }
  0xe4   : > { %p4335_p13 = pmov %p4333_p0 }
  0xe5   : > { %3464 = vsyncadd (%p4334_p10), [#allocation18], 4294967024 }
  0xe6   : > { %3466 = dma.done.wait (%p4335_p13), [#allocation21], 256   ;;  %p4336_p3 = pmov %p4333_p0 }
  0xe7   : > { %s2667_s21 = sshll.u32 %s3899_s10, 3  ;;  %s4337_s0 = sld [smem:[#allocation32_spill]] }
  0xe8   : > { %3468 = vsyncadd (%p4336_p3), [#allocation21], 4294967040  ;;  %s3925_s2 = scalar_lea.vmem [#allocation22], %s2667_s21 }
  0xed   : > { %p2668_p8 = scmp.ne.s32.totalorder %s4337_s0, 0 }
  0xee   : > { %s4338_s29 = sld [smem:[#allocation47_spill]] (!%p2668_p8)  ;;  %s3533_s28 = smov (!%p2668_p8), 120  }
  0xef   : > { %649 = sbr.rel (%p2668_p8) target bundleno = 927 (0x39f), region = 116  ;;  %s4340_s23 = sld [smem:[#allocation48_spill]] (!%p2668_p8) }
  0xf0   : > { %s3534_s3 = smov (!%p2668_p8), 112   ;;  %s3535_s6 = smov (!%p2668_p8), 104  }
  0xf4   : > { %v650_v0 = vld [vmem:[%s3885_s15] sm:$0xff]  ;;  %vm652_vm0 = vcmask 261120   ;;  %v651_v1 = vld [vmem:[%s3885_s15 + $0x8] sm:$0xff]  ;;  %s4339_s1 = smov %s4338_s29  ;;  %v3531_v16 = vmov 0.0   ;;  %vm3532_vm1 = vmmov 0   ;;  %v869_v56 = vlaneseq }
  0xf5   : > { %v653_v2 = vsel %vm652_vm0, %v650_v0, 0.0  ;;  %v656_v3 = vsel %vm652_vm0, %v651_v1, 0.0  ;;  %v3068_v14 = vld [vmem:[%s4338_s29 + $0x8] sm:$0xff]   ;;  %2792 = vmatprep.subr.bf16.mxu1 %v3531_v16  ;;  %2784 = vmatprep.subr.bf16.mxu0 %v3531_v16  ;;  %v3070_v17 = vld [vmem:[%s4339_s1] sm:$0xff]   ;;  %v3072_v35 = vld [vmem:[%s3892_s7] sm:$0xff]   ;;  %vm1168_vm2 = vcmask 60416  }
  0xf6   : > { %654 = vadd.xlane.f32.xlu0 %v653_v2  ;;  %v3069_v15 = vld [vmem:[#allocation17 + $0x8] sm:$0xff]   ;;  %2793 = vmatpush3.bf16.msra.mxu1 %v3068_v14  ;;  %v3071_v18 = vld [vmem:[#allocation17] sm:$0xff]   ;;  %v2672_v40 = vld [vmem:[#allocation19] ss:$0 sm:$0xff]  ;;  %v3536_v54 = vmov 1983009808  }
  0xf7   : > { %2785 = vmatpush3.bf16.msra.mxu0 %v3069_v15  ;;  %2794 = vmatprep.subr.bf16.mxu1 %v3531_v16  ;;  %v2669_v26 = vld [vmem:[#allocation11] ss:$0 sm:$0xff]  ;;  %v2670_v28 = vld [vmem:[#allocation13] ss:$0 sm:$0xff]  ;;  %v2676_v38 = vld [vmem:[%s4340_s23] ss:$0 sm:$0xff]  ;;  %v867_v55 = vunpack.c.l.s4 %v3536_v54 }
  0xf8   : > { %2786 = vmatprep.subr.bf16.mxu0 %v3531_v16  ;;  %2796 = vmatprep.mubr.msk.bf16.mxu1 %vm3532_vm1, %v3531_v16  ;;  %v3537_v59 = vmov 1934713408   ;;  %v870_v62 = vshrl.u32 %v869_v56, 7 }
  0xf9   : > { %2788 = vmatprep.mubr.msk.bf16.mxu0 %vm3532_vm1, %v3531_v16  ;;  %v899_v60 = vunpack.c.l.s4 %v3537_v59  ;;  %v868_v61 = vunpack.c.0.s8 %v867_v55 }
  0xfa   : > { %657 = vadd.xlane.f32.xlu0 %v656_v3  ;;  %2795 = vmatpush3.bf16.msra.mxu1 %v3070_v17 }
  0xfb   : > { %2787 = vmatpush3.bf16.msra.mxu0 %v3071_v18  ;;  %v3962_v2 = vsub.s32 %v868_v61, %v870_v62 }
 0x17f   : > { %v655_v4 = vpop.xlane.xlu0 %654 }
 0x180   : > { %v660_v5 = vmul.f32 0.03125, %v655_v4 }
 0x182   : > { %v662_v6 = vsub.f32 %v650_v0, %v660_v5 }
 0x183   : > { %v658_v7 = vpop.xlane.xlu0 %657 }
 0x184   : > { %v661_v8 = vmul.f32 0.03125, %v658_v7  ;;  %v664_v9 = vmul.f32 %v662_v6, %v662_v6 }
 0x186   : > { %v663_v10 = vsub.f32 %v651_v1, %v661_v8  ;;  %v666_v11 = vsel %vm652_vm0, %v664_v9, 0.0  ;;  %v900_v1 = vunpack.c.0.s8 %v899_v60 }
 0x187   : > { %667 = vadd.xlane.f32.xlu1 %v666_v11 }
 0x188   : > { %v665_v12 = vmul.f32 %v663_v10, %v663_v10 }
 0x18a   : > { %v669_v13 = vsel %vm652_vm0, %v665_v12, 0.0 }
 0x18b   : > { %670 = vadd.xlane.f32.xlu1 %v669_v13 }
 0x210   : > { %v668_v19 = vpop.xlane.xlu1 %667 }
 0x211   : > { %v672_v20 = vmul.f32 0.03125, %v668_v19 }
 0x213   : > { %v674_v21 = vadd.f32 1e-05, %v672_v20 }
 0x214   : > { %v671_v22 = vpop.xlane.xlu1 %670 }
 0x215   : > { %3073 = vrsqrt.f32 %v674_v21  ;;  %v673_v23 = vmul.f32 0.03125, %v671_v22 }
 0x217   : > { %v675_v24 = vadd.f32 1e-05, %v673_v23 }
 0x219   : > { %3075 = vrsqrt.f32 %v675_v24 }
 0x222   : > { %v3074_v25 = vpop.eup %3073 }
 0x223   : > { %v678_v27 = vmul.f32 %v3074_v25, %v662_v6 }
 0x225   : > { %v687_v29 = vmul.f32 %v2669_v26, %v678_v27 }
 0x226   : > { %v3076_v30 = vpop.eup %3075 }
 0x227   : > { %v679_v31 = vmul.f32 %v3076_v30, %v663_v10  ;;  %v696_v32 = vadd.f32 %v2670_v28, %v687_v29  ;;  %v3964_v10 = vsub.s32 %v900_v1, %v870_v62 }
 0x229   : > { %v688_v33 = vmul.f32 %v2669_v26, %v679_v31  ;;  %698 = vst.msk [vmem:[#allocation2] sm:$0xff] %vm652_vm0, %v696_v32 }
 0x22b   : > { %v697_v34 = vadd.f32 %v2670_v28, %v688_v33 }
 0x22d   : > { %699 = vst.msk [vmem:[#allocation2 + $0x8] sm:$0xff] %vm652_vm0, %v697_v34  ;;  %v700_v36 = vpack.c.bf16 %v697_v34, %v696_v32 }
 0x22f   : > { %2797 = vmatmul.mubr.msk.bf16.vlgmr.msra.gmra.mxu1 %vm652_vm0, %v700_v36  ;;  %v709_v37 = vadd.bf16 %v3072_v35, %v700_v36 }
 0x231   : > { %2789 = vmatmul.mubr.msk.bf16.vlgmr.msra.gmra.mxu0 %vm652_vm0, %v709_v37 }
 0x2ef   : > { %v837_v39 = vpop.f32.mrf.mxu1 }
 0x2f0   : > { %v838_v41 = vadd.f32 %v2676_v38, %v837_v39 }
 0x2f1   : > { %v770_v42 = vpop.f32.mrf.mxu0  ;;  %v2798_v43 = vpop.f32.mrf.mxu1 }
 0x2f2   : > { %v771_v44 = vadd.f32 %v2672_v40, %v770_v42  ;;  %1179 = vrot.lane.b32.xlu0 %v838_v41, %s3533_s28 }
 0x2f3   : > { %v2790_v45 = vpop.f32.mrf.mxu0  ;;  %v840_v46 = vpop.f32.mrf.mxu1 }
 0x2f4   : > { %852 = vrot.lane.b32.xlu1 %v771_v44, %s3534_s3  ;;  %v3948_v49 = vadd.f32 %v2676_v38, %v840_v46 }
 0x2f5   : > { %v773_v47 = vpop.f32.mrf.mxu0  ;;  %v2799_v48 = vpop.f32.mrf.mxu1 }
 0x2f6   : > { %1185 = vrot.lane.b32.xlu0 %v838_v41, %s3534_s3  ;;  %v3952_v51 = vadd.f32 %v2672_v40, %v773_v47 }
 0x2f7   : > { %v2791_v50 = vpop.f32.mrf.mxu0 }
 0x2f8   : > { %1181 = vrot.lane.b32.xlu1 %v3948_v49, %s3533_s28 }
 0x2fa   : > { %846 = vrot.lane.b32.xlu0 %v771_v44, %s3533_s28 }
 0x2fc   : > { %1187 = vrot.lane.b32.xlu1 %v3948_v49, %s3534_s3 }
 0x2fe   : > { %858 = vrot.lane.b32.xlu0 %v771_v44, %s3535_s6 }
 0x300   : > { %848 = vrot.lane.b32.xlu1 %v3952_v51, %s3533_s28 }
 0x302   : > { %1191 = vrot.lane.b32.xlu0 %v838_v41, %s3535_s6 }
 0x304   : > { %854 = vrot.lane.b32.xlu1 %v3952_v51, %s3534_s3 }
 0x308   : > { %860 = vrot.lane.b32.xlu1 %v3952_v51, %s3535_s6 }
 0x30c   : > { %1193 = vrot.lane.b32.xlu1 %v3948_v49, %s3535_s6 }
 0x364   : > { %v1180_v52 = vpop.permute.xlu0 %1179 }
 0x366   : > { %v853_v53 = vpop.permute.xlu1 %852 }
 0x367   : > { %v864_v3 = vcombine.low %v771_v44, %v853_v53  ;;  %v865_v4 = vcombine.high %v771_v44, %v853_v53 }
 0x368   : > { %v1186_v57 = vpop.permute.xlu0 %1185 }
 0x369   : > { %v1197_v5 = vcombine.low %v838_v41, %v1186_v57  ;;  %v1198_v6 = vcombine.high %v838_v41, %v1186_v57  ;;  %v872_v12 = vrot.slane %v864_v3, %v3962_v2  ;;  %v879_v13 = vrot.slane %v865_v4, %v3962_v2 }
 0x36a   : > { %v3958_v58 = vpop.permute.xlu1 %1181 }
 0x36b   : > { %v1205_v16 = vrot.slane %v1197_v5, %v3962_v2  ;;  %v1212_v17 = vrot.slane %v1198_v6, %v3962_v2 }
 0x36c   : > { %v847_v63 = vpop.permute.xlu0 %846 }
 0x36e   : > { %v3960_v0 = vpop.permute.xlu1 %1187 }
 0x36f   : > { %v1265_v23 = vcombine.low %v3948_v49, %v3960_v0  ;;  %v1266_v24 = vcombine.high %v3948_v49, %v3960_v0 }
 0x370   : > { %v859_v7 = vpop.permute.xlu0 %858 }
 0x371   : > { %v880_v8 = vcombine.low %v847_v63, %v859_v7  ;;  %v881_v9 = vcombine.high %v847_v63, %v859_v7 }
 0x372   : > { %v3966_v11 = vpop.permute.xlu1 %848 }
 0x373   : > { %v888_v14 = vrot.slane %v880_v8, %v3962_v2  ;;  %v895_v15 = vrot.slane %v881_v9, %v3962_v2 }
 0x374   : > { %v1192_v18 = vpop.permute.xlu0 %1191 }
 0x375   : > { %v896_v19 = vcombine.low %v872_v12, %v888_v14  ;;  %v897_v20 = vcombine.high %v872_v12, %v888_v14  ;;  %v912_v21 = vcombine.low %v879_v13, %v895_v15  ;;  %v913_v22 = vcombine.high %v879_v13, %v895_v15 }
 0x376   : > { %v1213_v25 = vcombine.low %v1180_v52, %v1192_v18  ;;  %v1214_v26 = vcombine.high %v1180_v52, %v1192_v18  ;;  %v3978_v27 = vpop.permute.xlu1 %854 }
 0x377   : > { %v904_v28 = vrot.slane %v896_v19, %v3964_v10  ;;  %v911_v29 = vrot.slane %v897_v20, %v3964_v10  ;;  %v920_v30 = vrot.slane %v912_v21, %v3964_v10  ;;  %v927_v31 = vrot.slane %v913_v22, %v3964_v10 }
 0x378   : > { %v1221_v32 = vrot.slane %v1213_v25, %v3962_v2  ;;  %v1228_v33 = vrot.slane %v1214_v26, %v3962_v2  ;;  %v932_v34 = vcombine.low %v3952_v51, %v3978_v27  ;;  %v933_v35 = vcombine.high %v3952_v51, %v3978_v27 }
 0x379   : > { %v1000_v36 = vcombine.low %v904_v28, %v911_v29  ;;  %v2680_v37 = vcombine.high %v904_v28, %v911_v29  ;;  %v1016_v38 = vcombine.low %v920_v30, %v927_v31  ;;  %v2681_v39 = vcombine.high %v920_v30, %v927_v31 }
 0x37a   : > { %v1229_v40 = vcombine.low %v1205_v16, %v1221_v32  ;;  %v1230_v41 = vcombine.high %v1205_v16, %v1221_v32  ;;  %v1245_v42 = vcombine.low %v1212_v17, %v1228_v33  ;;  %v1246_v43 = vcombine.high %v1212_v17, %v1228_v33  ;;  %v861_v62 = vpop.permute.xlu1 %860 }
 0x37b   : > { %v1007_v44 = vrot.slane %v1000_v36, %v3962_v2  ;;  %v1015_v45 = vrot.slane %v2680_v37, %v3962_v2  ;;  %v1023_v46 = vrot.slane %v1016_v38, %v3962_v2  ;;  %v1031_v47 = vrot.slane %v2681_v39, %v3962_v2 }
 0x37c   : > { %v1237_v48 = vrot.slane %v1229_v40, %v3964_v10  ;;  %v1244_v50 = vrot.slane %v1230_v41, %v3964_v10  ;;  %v1253_v51 = vrot.slane %v1245_v42, %v3964_v10  ;;  %v1260_v52 = vrot.slane %v1246_v43, %v3964_v10 }
 0x37d   : > { %v1032_v53 = vcombine.low %v1007_v44, %v1015_v45  ;;  %v1033_v54 = vcombine.high %v1007_v44, %v1015_v45  ;;  %v1048_v55 = vcombine.low %v1023_v46, %v1031_v47  ;;  %v1049_v56 = vcombine.high %v1023_v46, %v1031_v47 }
 0x37e   : > { %v1333_v57 = vcombine.low %v1237_v48, %v1244_v50  ;;  %v2692_v59 = vcombine.high %v1237_v48, %v1244_v50  ;;  %v1349_v60 = vcombine.low %v1253_v51, %v1260_v52  ;;  %v2693_v61 = vcombine.high %v1253_v51, %v1260_v52  ;;  %v1194_v29 = vpop.permute.xlu1 %1193 }
 0x37f   : > { %v1040_v63 = vrot.slane %v1032_v53, %v3964_v10  ;;  %v1047_v1 = vrot.slane %v1033_v54, %v3964_v10  ;;  %v1056_v3 = vrot.slane %v1048_v55, %v3964_v10  ;;  %v1063_v4 = vrot.slane %v1049_v56, %v3964_v10 }
 0x380   : > { %v1340_v5 = vrot.slane %v1333_v57, %v3962_v2  ;;  %v1348_v6 = vrot.slane %v2692_v59, %v3962_v2  ;;  %v1356_v7 = vrot.slane %v1349_v60, %v3962_v2  ;;  %v1364_v8 = vrot.slane %v2693_v61, %v3962_v2 }
 0x381   : > { %v1064_v9 = vcombine.low %v1040_v63, %v1056_v3  ;;  %v1065_v12 = vcombine.high %v1040_v63, %v1056_v3  ;;  %v1066_v13 = vcombine.low %v1047_v1, %v1063_v4  ;;  %v1067_v14 = vcombine.high %v1047_v1, %v1063_v4 }
 0x382   : > { %v1365_v15 = vcombine.low %v1340_v5, %v1348_v6  ;;  %v1366_v16 = vcombine.high %v1340_v5, %v1348_v6  ;;  %v1381_v17 = vcombine.low %v1356_v7, %v1364_v8  ;;  %v1382_v18 = vcombine.high %v1356_v7, %v1364_v8 }
 0x383   : > { %v2740_v19 = vpack.c.bf16 %v1064_v9, %v1064_v9  ;;  %v2742_v20 = vpack.c.bf16 %v1065_v12, %v1065_v12  ;;  %v2744_v21 = vpack.c.bf16 %v1066_v13, %v1066_v13  ;;  %v2746_v22 = vpack.c.bf16 %v1067_v14, %v1067_v14 }
 0x384   : > { %v1373_v25 = vrot.slane %v1365_v15, %v3964_v10  ;;  %v1380_v26 = vrot.slane %v1366_v16, %v3964_v10  ;;  %v1389_v27 = vrot.slane %v1381_v17, %v3964_v10  ;;  %v1396_v28 = vrot.slane %v1382_v18, %v3964_v10 }
 0x385   : > { %1169 = vst.msk [vmem:[#allocation3] sm:$0xf] %vm1168_vm2, %v2740_v19  ;;  %1171 = vst.msk [vmem:[#allocation3 + $0x8] sm:$0xf] %vm1168_vm2, %v2742_v20  ;;  %v940_v30 = vrot.slane %v932_v34, %v3962_v2  ;;  %v947_v31 = vrot.slane %v933_v35, %v3962_v2  ;;  %v948_v32 = vcombine.low %v3966_v11, %v861_v62 }
 0x386   : > { %1173 = vst.msk [vmem:[#allocation3 + $0x10] sm:$0xf] %vm1168_vm2, %v2744_v21  ;;  %1175 = vst.msk [vmem:[#allocation3 + $0x18] sm:$0xf] %vm1168_vm2, %v2746_v22  ;;  %v949_v33 = vcombine.high %v3966_v11, %v861_v62  ;;  %v1397_v36 = vcombine.low %v1373_v25, %v1389_v27  ;;  %v1398_v37 = vcombine.high %v1373_v25, %v1389_v27 }
 0x387   : > { %v1399_v38 = vcombine.low %v1380_v26, %v1396_v28  ;;  %v1400_v39 = vcombine.high %v1380_v26, %v1396_v28  ;;  %v956_v40 = vrot.slane %v948_v32, %v3962_v2  ;;  %v1281_v42 = vcombine.low %v3958_v58, %v1194_v29 }
 0x388   : > { %v963_v41 = vrot.slane %v949_v33, %v3962_v2  ;;  %v1282_v43 = vcombine.high %v3958_v58, %v1194_v29  ;;  %v2748_v44 = vpack.c.bf16 %v1397_v36, %v1397_v36  ;;  %v2750_v34 = vpack.c.bf16 %v1398_v37, %v1398_v37 }
 0x389   : > { %v2752_v45 = vpack.c.bf16 %v1399_v38, %v1399_v38  ;;  %v2754_v35 = vpack.c.bf16 %v1400_v39, %v1400_v39  ;;  %v964_v46 = vcombine.low %v940_v30, %v956_v40  ;;  %v965_v47 = vcombine.high %v940_v30, %v956_v40 }
 0x38a   : > { %v980_v48 = vcombine.low %v947_v31, %v963_v41  ;;  %v981_v11 = vcombine.high %v947_v31, %v963_v41  ;;  %v1273_v50 = vrot.slane %v1265_v23, %v3962_v2  ;;  %v1280_v51 = vrot.slane %v1266_v24, %v3962_v2  ;;  %1501 = vst.msk [vmem:[#allocation4] sm:$0xf] %vm1168_vm2, %v2748_v44 }
 0x38b   : > { %1503 = vst.msk [vmem:[#allocation4 + $0x8] sm:$0xf] %vm1168_vm2, %v2750_v34  ;;  %1505 = vst.msk [vmem:[#allocation4 + $0x10] sm:$0xf] %vm1168_vm2, %v2752_v45  ;;  %v1289_v58 = vrot.slane %v1281_v42, %v3962_v2  ;;  %v1296_v52 = vrot.slane %v1282_v43, %v3962_v2  ;;  %v972_v53 = vrot.slane %v964_v46, %v3964_v10 }
 0x38c   : > { %1507 = vst.msk [vmem:[#allocation4 + $0x18] sm:$0xf] %vm1168_vm2, %v2754_v35  ;;  %v979_v23 = vrot.slane %v965_v47, %v3964_v10  ;;  %v988_v54 = vrot.slane %v980_v48, %v3964_v10  ;;  %v995_v49 = vrot.slane %v981_v11, %v3964_v10 }
 0x38d   : > { %v1297_v0 = vcombine.low %v1273_v50, %v1289_v58  ;;  %v1298_v24 = vcombine.high %v1273_v50, %v1289_v58  ;;  %v1313_v55 = vcombine.low %v1280_v51, %v1296_v52  ;;  %v1314_v56 = vcombine.high %v1280_v51, %v1296_v52 }
 0x38e   : > { %v1068_v57 = vcombine.low %v972_v53, %v979_v23  ;;  %v2682_v59 = vcombine.high %v972_v53, %v979_v23  ;;  %v1084_v60 = vcombine.low %v988_v54, %v995_v49  ;;  %v2683_v61 = vcombine.high %v988_v54, %v995_v49 }
 0x38f   : > { %v1305_v62 = vrot.slane %v1297_v0, %v3964_v10  ;;  %v1312_v63 = vrot.slane %v1298_v24, %v3964_v10  ;;  %v1321_v1 = vrot.slane %v1313_v55, %v3964_v10  ;;  %v1328_v3 = vrot.slane %v1314_v56, %v3964_v10 }
 0x390   : > { %v1075_v4 = vrot.slane %v1068_v57, %v3962_v2  ;;  %v1083_v5 = vrot.slane %v2682_v59, %v3962_v2  ;;  %v1091_v6 = vrot.slane %v1084_v60, %v3962_v2  ;;  %v1099_v7 = vrot.slane %v2683_v61, %v3962_v2 }
 0x391   : > { %v1401_v8 = vcombine.low %v1305_v62, %v1312_v63  ;;  %v2694_v9 = vcombine.high %v1305_v62, %v1312_v63  ;;  %v1417_v12 = vcombine.low %v1321_v1, %v1328_v3  ;;  %v2695_v13 = vcombine.high %v1321_v1, %v1328_v3 }
 0x392   : > { %v1100_v14 = vcombine.low %v1075_v4, %v1083_v5  ;;  %v1101_v15 = vcombine.high %v1075_v4, %v1083_v5  ;;  %v1116_v16 = vcombine.low %v1091_v6, %v1099_v7  ;;  %v1117_v17 = vcombine.high %v1091_v6, %v1099_v7 }
 0x393   : > { %v1408_v18 = vrot.slane %v1401_v8, %v3962_v2  ;;  %v1416_v19 = vrot.slane %v2694_v9, %v3962_v2  ;;  %v1424_v20 = vrot.slane %v1417_v12, %v3962_v2  ;;  %v1432_v21 = vrot.slane %v2695_v13, %v3962_v2 }
 0x394   : > { %v1108_v22 = vrot.slane %v1100_v14, %v3964_v10  ;;  %v1115_v25 = vrot.slane %v1101_v15, %v3964_v10  ;;  %v1124_v26 = vrot.slane %v1116_v16, %v3964_v10  ;;  %v1131_v27 = vrot.slane %v1117_v17, %v3964_v10 }
 0x395   : > { %v1433_v28 = vcombine.low %v1408_v18, %v1416_v19  ;;  %v1434_v29 = vcombine.high %v1408_v18, %v1416_v19  ;;  %v1449_v30 = vcombine.low %v1424_v20, %v1432_v21  ;;  %v1450_v31 = vcombine.high %v1424_v20, %v1432_v21 }
 0x396   : > { %v1132_v32 = vcombine.low %v1108_v22, %v1124_v26  ;;  %v1133_v33 = vcombine.high %v1108_v22, %v1124_v26  ;;  %v1134_v36 = vcombine.low %v1115_v25, %v1131_v27  ;;  %v1135_v37 = vcombine.high %v1115_v25, %v1131_v27 }
 0x397   : > { %v1441_v38 = vrot.slane %v1433_v28, %v3964_v10  ;;  %v1448_v2 = vrot.slane %v1434_v29, %v3964_v10  ;;  %v1457_v39 = vrot.slane %v1449_v30, %v3964_v10  ;;  %v1464_v40 = vrot.slane %v1450_v31, %v3964_v10 }
 0x398   : > { %v2741_v41 = vpack.c.bf16 %v1132_v32, %v1132_v32  ;;  %v2743_v42 = vpack.c.bf16 %v1133_v33, %v1133_v33  ;;  %v2745_v43 = vpack.c.bf16 %v1134_v36, %v1134_v36  ;;  %v2747_v44 = vpack.c.bf16 %v1135_v37, %v1135_v37 }
 0x399   : > { %v1465_v34 = vcombine.low %v1441_v38, %v1457_v39  ;;  %v1466_v45 = vcombine.high %v1441_v38, %v1457_v39  ;;  %v1467_v35 = vcombine.low %v1448_v2, %v1464_v40  ;;  %v1468_v46 = vcombine.high %v1448_v2, %v1464_v40 }
 0x39a   : > { %1170 = vst.msk [vmem:[#allocation3 + $0x4] sm:$0xf] %vm1168_vm2, %v2741_v41  ;;  %1172 = vst.msk [vmem:[#allocation3 + $0xc] sm:$0xf] %vm1168_vm2, %v2743_v42 }
 0x39b   : > { %1174 = vst.msk [vmem:[#allocation3 + $0x14] sm:$0xf] %vm1168_vm2, %v2745_v43  ;;  %1176 = vst.msk [vmem:[#allocation3 + $0x1c] sm:$0xf] %vm1168_vm2, %v2747_v44  ;;  %v2749_v47 = vpack.c.bf16 %v1465_v34, %v1465_v34  ;;  %v2751_v48 = vpack.c.bf16 %v1466_v45, %v1466_v45  ;;  %v2753_v11 = vpack.c.bf16 %v1467_v35, %v1467_v35 }
 0x39c   : > { %v2755_v10 = vpack.c.bf16 %v1468_v46, %v1468_v46 }
 0x39d   : > { %1502 = vst.msk [vmem:[#allocation4 + $0x4] sm:$0xf] %vm1168_vm2, %v2749_v47  ;;  %1504 = vst.msk [vmem:[#allocation4 + $0xc] sm:$0xf] %vm1168_vm2, %v2751_v48 }
 0x39e   : > { %1506 = vst.msk [vmem:[#allocation4 + $0x14] sm:$0xf] %vm1168_vm2, %v2753_v11  ;;  %1508 = vst.msk [vmem:[#allocation4 + $0x1c] sm:$0xf] %vm1168_vm2, %v2755_v10 }
 0x39f PF: > { %v3077_v50 = vld [vmem:[#allocation14 + $0x8] sm:$0xff]   ;;  %s4341_s7 = sld [smem:[#allocation32_spill]]  ;;  %v3538_v51 = vmov 0.0   ;;  %v3078_v58 = vld [vmem:[#allocation14] sm:$0xff]   ;;  %vm3539_vm3 = vmmov 0   ;;  %vm1540_vm4 = vcmask 261120   ;;  %v1599_v3 = vlaneseq }
 0x3a0   : > { %2800 = vmatprep.subr.bf16.mxu0 %v3538_v51  ;;  %2808 = vmatprep.subr.bf16.mxu1 %v3538_v51  ;;  %v1515_v52 = vld [vmem:[%s3902_s5] sm:$0xf]  ;;  %v2705_v49 = vld [vmem:[#allocation16] ss:$0 sm:$0xff]  ;;  %s3540_s5 = smov 104   ;;  %s3541_s0 = smov 120  }
 0x3a1   : > { %2801 = vmatpush3.bf16.msra.mxu0 %v3077_v50  ;;  %2804 = vmatprep.mubr.msk.bf16.mxu0 %vm3539_vm3, %v3538_v51  ;;  %v3079_v57 = vld [vmem:[#allocation3] sm:$0xff]   ;;  %v3080_v59 = vld [vmem:[#allocation3 + $0x8] sm:$0xff]   ;;  %vm1755_vm5 = vcmask 64512   ;;  %s3542_s19 = smov 112   ;;  %v3543_v63 = vmov 1983009808  }
 0x3a2   : > { %2802 = vmatprep.subr.bf16.mxu0 %v3538_v51  ;;  %2810 = vmatprep.mubr.msk.bf16.mxu1 %vm3539_vm3, %v3538_v51  ;;  %v1760_v61 = vsel %vm1755_vm5, %v3079_v57, 0  ;;  %v1811_v62 = vsel %vm1755_vm5, %v3080_v59, 0  ;;  %v1597_v1 = vunpack.c.l.s4 %v3543_v63  ;;  %v3544_v4 = vmov 1934713408   ;;  %v3081_v34 = vld [vmem:[#allocation3 + $0x10] sm:$0xff]   ;;  %v3082_v45 = vld [vmem:[#allocation3 + $0x18] sm:$0xff]  }
 0x3a3   : > { %2809 = vmatpush3.bf16.xpose.msra.mxu1 %v1760_v61  ;;  %v1629_v5 = vunpack.c.l.s4 %v3544_v4  ;;  %v1600_v7 = vshrl.u32 %v1599_v3, 7  ;;  %v1862_v50 = vsel %vm1755_vm5, %v3081_v34, 0  ;;  %vm1955_vm6 = vcmask 130048   ;;  %s3545_s4 = smov 16   ;;  %s4342_s29 = sld [smem:[#allocation33_spill]] }
 0x3a4   : > { %2820 = vmatprep.subr.bf16.mxu1 %v3538_v51  ;;  %v1598_v6 = vunpack.c.0.s8 %v1597_v1  ;;  %s3546_s8 = smov 8   ;;  %s3547_s11 = smov 24   ;;  %vm2350_vm7 = vcmask 195584  }
 0x3a5   : > { %s2704_s20 = sshll.u32 %s4341_s7, 3  ;;  %2803 = vmatpush3.bf16.msra.mxu0 %v3078_v58  ;;  %v1630_v12 = vunpack.c.0.s8 %v1629_v5  ;;  %v1913_v58 = vsel %vm1755_vm5, %v3082_v45, 0  ;;  %s4343_s6 = sld [smem:[#allocation50_spill]] }
 0x3a6   : > { %s1510_s21 = scalar_lea.vmem [#allocation2], %s2704_s20  ;;  %2814 = vmatprep.subr.bf16.mxu0 %v3538_v51  ;;  %v4087_v13 = vsub.s32 %v1598_v6, %v1600_v7  ;;  %s1512_s12 = scalar_lea.vmem %s3885_s15, %s2704_s20 [#allocation5] }
 0x3a7   : > { %v1511_v53 = vld [vmem:[%s1510_s21] sm:$0xff]  ;;  %v4089_v19 = vsub.s32 %v1630_v12, %v1600_v7  ;;  %s2422_s15 = scalar_lea.sflag [#allocation7], %s3899_s10  ;;  %s3548_s20 = smov [#allocation22]  }
 0x3a8   : > { %v1514_v23 = vpack.c.bf16 %v1511_v53, %v1511_v53 }
 0x3a9   : > { %s2734_s14 = sshll.u32 %s4342_s29, 1 }
 0x3aa   : > { %v1516_v54 = vadd.bf16 %v1515_v52, %v1514_v23  ;;  %s2433_s23 = sadd.s32 %s4341_s7, %s2734_s14 }
 0x3ab   : > { %s2735_s21 = sshll.u32 %s2433_s23, 7 }
 0x3ac   : > { %2805 = vmatmul.mubr.msk.bf16.vlgmr.msra.gmra.mxu0 %vm1540_vm4, %v1516_v54 }
 0x3ad   : > { %2816 = vmatprep.mubr.msk.bf16.mxu0 %vm3539_vm3, %v3538_v51  ;;  %2815 = vmatpush3.bf16.xpose.msra.mxu0 %v1811_v62 }
 0x3ae   : > { %2826 = vmatprep.subr.bf16.mxu0 %v3538_v51 }
 0x46c   : > { %v1578_v0 = vpop.f32.mrf.mxu0 }
 0x46d   : > { %v1579_v24 = vadd.f32 %v2705_v49, %v1578_v0 }
 0x46e   : > { %v2806_v55 = vpop.f32.mrf.mxu0 }
 0x46f   : > { %1591 = vrot.lane.b32.xlu1 %v1579_v24, %s3540_s5  ;;  %1585 = vrot.lane.b32.xlu0 %v1579_v24, %s3541_s0  ;;  %s2437_s5 = sshll.u32 %s3925_s2, 4  ;;  %s4178_s5 = int_to_ptr.vmem [resolvable:$true] %s2437_s5 }
 0x470   : > { %v1581_v56 = vpop.f32.mrf.mxu0  ;;  %s3371_s7 = scalar_lea.vmem %s4178_s5, 128 }
 0x471   : > { %p3372_p12 = scmp.ne.s32.totalorder %s4178_s5, %s3371_s7 }
 0x472   : > { %v2807_v60 = vpop.f32.mrf.mxu0 }
 0x473   : > { %1588 = vrot.lane.b32.xlu0 %v1579_v24, %s3542_s19  ;;  %p3373_p9 = pnand %p3372_p12, %p3845_p5 }
 0x475   : > { %p3374_p4 = pneg %p3373_p9 }
 0x4e1   : > { %v1592_v8 = vpop.permute.xlu1 %1591  ;;  %v1586_v9 = vpop.permute.xlu0 %1585 }
 0x4e2   : > { %v1610_v14 = vcombine.low %v1586_v9, %v1592_v8  ;;  %v1611_v15 = vcombine.high %v1586_v9, %v1592_v8 }
 0x4e4   : > { %v1618_v20 = vrot.slane %v1610_v14, %v4087_v13  ;;  %v1625_v21 = vrot.slane %v1611_v15, %v4087_v13 }
 0x4e5   : > { %v1589_v16 = vpop.permute.xlu0 %1588 }
 0x4e6   : > { %v1594_v17 = vcombine.low %v1579_v24, %v1589_v16  ;;  %v1595_v18 = vcombine.high %v1579_v24, %v1589_v16 }
 0x4e8   : > { %v1602_v22 = vrot.slane %v1594_v17, %v4087_v13  ;;  %v1609_v25 = vrot.slane %v1595_v18, %v4087_v13 }
 0x4ea   : > { %v1626_v26 = vcombine.low %v1602_v22, %v1618_v20  ;;  %v1627_v27 = vcombine.high %v1602_v22, %v1618_v20  ;;  %v1642_v28 = vcombine.low %v1609_v25, %v1625_v21  ;;  %v1643_v29 = vcombine.high %v1609_v25, %v1625_v21 }
 0x4ec   : > { %v1634_v30 = vrot.slane %v1626_v26, %v4089_v19  ;;  %v1641_v31 = vrot.slane %v1627_v27, %v4089_v19  ;;  %v1650_v32 = vrot.slane %v1642_v28, %v4089_v19  ;;  %v1657_v33 = vrot.slane %v1643_v29, %v4089_v19 }
 0x4ee   : > { %v1662_v36 = vcombine.low %v1634_v30, %v1641_v31  ;;  %v2709_v37 = vcombine.high %v1634_v30, %v1641_v31  ;;  %v1678_v38 = vcombine.low %v1650_v32, %v1657_v33  ;;  %v2710_v2 = vcombine.high %v1650_v32, %v1657_v33 }
 0x4f0   : > { %v1669_v39 = vrot.slane %v1662_v36, %v4087_v13  ;;  %v1677_v40 = vrot.slane %v2709_v37, %v4087_v13  ;;  %v1685_v41 = vrot.slane %v1678_v38, %v4087_v13  ;;  %v1693_v42 = vrot.slane %v2710_v2, %v4087_v13 }
 0x4f2   : > { %v1694_v43 = vcombine.low %v1669_v39, %v1677_v40  ;;  %v1710_v44 = vcombine.low %v1685_v41, %v1693_v42  ;;  %v1695_v35 = vcombine.high %v1669_v39, %v1677_v40  ;;  %v1711_v46 = vcombine.high %v1685_v41, %v1693_v42  ;;  %v3083_v42 = vld [vmem:[#allocation4] sm:$0xff]  }
 0x4f4   : > { %v1702_v47 = vrot.slane %v1694_v43, %v4089_v19  ;;  %v1718_v48 = vrot.slane %v1710_v44, %v4089_v19  ;;  %v1709_v23 = vrot.slane %v1695_v35, %v4089_v19  ;;  %v1725_v54 = vrot.slane %v1711_v46, %v4089_v19  ;;  %v3084_v43 = vld [vmem:[#allocation4 + $0x8] sm:$0xff]  }
 0x4f6   : > { %v1726_v11 = vcombine.low %v1702_v47, %v1718_v48  ;;  %v1727_v10 = vcombine.high %v1702_v47, %v1718_v48  ;;  %v1728_v49 = vcombine.low %v1709_v23, %v1725_v54  ;;  %v1729_v0 = vcombine.high %v1709_v23, %v1725_v54 }
 0x4f8   : > { %v1730_v52 = vpack.c.bf16 %v1726_v11, %v1726_v11  ;;  %v1731_v53 = vpack.c.bf16 %v1727_v10, %v1727_v10  ;;  %v1732_v24 = vpack.c.bf16 %v1728_v49, %v1728_v49  ;;  %v1733_v55 = vpack.c.bf16 %v1729_v0, %v1729_v0  ;;  %v3085_v10 = vld [vmem:[#allocation4 + $0x10] sm:$0xff]  }
 0x4fa   : > { %2811 = vmatmul.mubr.msk.bf16.vlgmr.msra.gmra.mxu1 %vm1755_vm5, %v1730_v52  ;;  %2817 = vmatmul.mubr.msk.bf16.vlgmr.msra.gmra.mxu0 %vm1755_vm5, %v1731_v53 }
 0x4fb   : > { %2821 = vmatpush3.bf16.xpose.msra.mxu1 %v1862_v50  ;;  %2827 = vmatpush3.bf16.xpose.msra.mxu0 %v1913_v58  ;;  %v3086_v58 = vld [vmem:[#allocation4 + $0x18] sm:$0xff]  }
 0x4fc   : > { %2822 = vmatprep.mubr.msk.bf16.mxu1 %vm3539_vm3, %v3538_v51  ;;  %2828 = vmatprep.mubr.msk.bf16.mxu0 %vm3539_vm3, %v3538_v51 }
 0x4fd   : > { %2832 = vmatprep.subr.bf16.mxu1 %v3538_v51  ;;  %2838 = vmatprep.subr.bf16.mxu0 %v3538_v51 }
 0x502   : > { %2823 = vmatmul.mubr.msk.bf16.vlgmr.msra.gmra.mxu1 %vm1755_vm5, %v1732_v24  ;;  %2829 = vmatmul.mubr.msk.bf16.vlgmr.msra.gmra.mxu0 %vm1755_vm5, %v1733_v55  ;;  %v3087_v55 = vld [vmem:[#allocation20 + $0x8] sm:$0xff]  }
 0x503   : > { %2834 = vmatprep.mubr.msk.bf16.mxu1 %vm3539_vm3, %v3538_v51  ;;  %2840 = vmatprep.mubr.msk.bf16.mxu0 %vm3539_vm3, %v3538_v51 }
 0x504   : > { %2833 = vmatpush3.bf16.msra.mxu1 %v3083_v42  ;;  %2839 = vmatpush3.bf16.msra.mxu0 %v3084_v43 }
 0x505   : > { %2844 = vmatprep.subr.bf16.mxu1 %v3538_v51  ;;  %2850 = vmatprep.subr.bf16.mxu0 %v3538_v51 }
 0x5ba   : > { %v1796_v56 = vpop.f32.mrf.mxu1  ;;  %v1847_v57 = vpop.f32.mrf.mxu0 }
 0x5bb   : > { %v1956_v59 = vsel %vm1955_vm6, %v1796_v56, -inf  ;;  %v1959_v60 = vsel %vm1955_vm6, %v1847_v57, -inf }
 0x5bc   : > { %1957 = vmax.xlane.f32.xlu1 %v1956_v59  ;;  %v2812_v61 = vpop.f32.mrf.mxu1  ;;  %1960 = vmax.xlane.f32.xlu0 %v1959_v60  ;;  %v2818_v62 = vpop.f32.mrf.mxu0 }
 0x5be   : > { %v1799_v63 = vpop.f32.mrf.mxu1  ;;  %v1850_v1 = vpop.f32.mrf.mxu0 }
 0x5c0   : > { %v2813_v3 = vpop.f32.mrf.mxu1  ;;  %v2819_v4 = vpop.f32.mrf.mxu0 }
 0x5c2   : > { %v1898_v5 = vpop.f32.mrf.mxu1  ;;  %v1949_v6 = vpop.f32.mrf.mxu0 }
 0x5c3   : > { %v1962_v7 = vsel %vm1955_vm6, %v1898_v5, -inf  ;;  %v1965_v8 = vsel %vm1955_vm6, %v1949_v6, -inf }
 0x5c4   : > { %v2824_v9 = vpop.f32.mrf.mxu1  ;;  %1963 = vmax.xlane.f32.xlu0 %v1962_v7  ;;  %1966 = vmax.xlane.f32.xlu1 %v1965_v8  ;;  %v2830_v12 = vpop.f32.mrf.mxu0 }
 0x5c6   : > { %v1901_v14 = vpop.f32.mrf.mxu1  ;;  %v1952_v15 = vpop.f32.mrf.mxu0 }
 0x5c8   : > { %v2825_v16 = vpop.f32.mrf.mxu1  ;;  %v2831_v17 = vpop.f32.mrf.mxu0 }
 0x645   : > { %v1958_v18 = vpop.xlane.xlu1 %1957  ;;  %v1961_v20 = vpop.xlane.xlu0 %1960 }
 0x646   : > { %v1968_v21 = vsub.f32 %v1796_v56, %v1958_v18  ;;  %v1969_v22 = vsub.f32 %v1847_v57, %v1961_v20 }
 0x648   : > { %v1972_v25 = vmul.f32 1.442695, %v1968_v21  ;;  %v1974_v26 = vmul.f32 1.442695, %v1969_v22 }
 0x64a   : > { %3089 = vpow2.f32 %v1972_v25 }
 0x64b   : > { %3091 = vpow2.f32 %v1974_v26 }
 0x64d   : > { %v1964_v27 = vpop.xlane.xlu0 %1963  ;;  %v1967_v28 = vpop.xlane.xlu1 %1966 }
 0x64e   : > { %v1970_v29 = vsub.f32 %v1898_v5, %v1964_v27  ;;  %v1971_v30 = vsub.f32 %v1949_v6, %v1967_v28  ;;  %v3088_v28 = vld [vmem:[#allocation20] sm:$0xff]  }
 0x650   : > { %v1976_v31 = vmul.f32 1.442695, %v1970_v29  ;;  %v1978_v32 = vmul.f32 1.442695, %v1971_v30 }
 0x652   : > { %3093 = vpow2.f32 %v1976_v31 }
 0x653   : > { %3095 = vpow2.f32 %v1978_v32 }
 0x657   : > { %v3090_v33 = vpop.eup %3089 }
 0x658   : > { %v3092_v36 = vpop.eup %3091  ;;  %v1980_v37 = vsel %vm1955_vm6, %v3090_v33, 0.0 }
 0x659   : > { %1981 = vadd.xlane.f32.xlu0 %v1980_v37  ;;  %v1983_v38 = vsel %vm1955_vm6, %v3092_v36, 0.0 }
 0x65a   : > { %1984 = vadd.xlane.f32.xlu1 %v1983_v38 }
 0x65f   : > { %v3094_v2 = vpop.eup %3093 }
 0x660   : > { %v3096_v39 = vpop.eup %3095  ;;  %v1986_v40 = vsel %vm1955_vm6, %v3094_v2, 0.0 }
 0x661   : > { %1987 = vadd.xlane.f32.xlu0 %v1986_v40  ;;  %v1989_v41 = vsel %vm1955_vm6, %v3096_v39, 0.0 }
 0x662   : > { %1990 = vadd.xlane.f32.xlu1 %v1989_v41 }
 0x6e2   : > { %v1982_v44 = vpop.xlane.xlu0 %1981 }
 0x6e3   : > { %3097 = vrcp.f32 %v1982_v44  ;;  %v1985_v34 = vpop.xlane.xlu1 %1984 }
 0x6e4   : > { %3099 = vrcp.f32 %v1985_v34 }
 0x6ea   : > { %v1988_v45 = vpop.xlane.xlu0 %1987 }
 0x6eb   : > { %3101 = vrcp.f32 %v1988_v45  ;;  %v1991_v35 = vpop.xlane.xlu1 %1990 }
 0x6ec   : > { %3103 = vrcp.f32 %v1991_v35 }
 0x6f0   : > { %v3098_v46 = vpop.eup %3097 }
 0x6f1   : > { %v3100_v47 = vpop.eup %3099  ;;  %v1996_v48 = vmul.f32 %v3098_v46, %v3090_v33 }
 0x6f2   : > { %v1997_v11 = vmul.f32 %v3100_v47, %v3092_v36 }
 0x6f3   : > { %v2000_v50 = vpack.c.bf16 %v1996_v48, %v1996_v48 }
 0x6f4   : > { %v2001_v52 = vpack.c.bf16 %v1997_v11, %v1997_v11 }
 0x6f5   : > { %2835 = vmatmul.mubr.msk.bf16.vlgmr.msra.gmra.mxu1 %vm1955_vm6, %v2000_v50 }
 0x6f6   : > { %2841 = vmatmul.mubr.msk.bf16.vlgmr.msra.gmra.mxu0 %vm1955_vm6, %v2001_v52  ;;  %2845 = vmatpush3.bf16.msra.mxu1 %v3085_v10 }
 0x6f7   : > { %2851 = vmatpush3.bf16.msra.mxu0 %v3086_v58  ;;  %2846 = vmatprep.mubr.msk.bf16.mxu1 %vm3539_vm3, %v3538_v51 }
 0x6f8   : > { %v3102_v53 = vpop.eup %3101  ;;  %2852 = vmatprep.mubr.msk.bf16.mxu0 %vm3539_vm3, %v3538_v51  ;;  %2856 = vmatprep.subr.bf16.mxu1 %v3538_v51 }
 0x6f9   : > { %v3104_v23 = vpop.eup %3103  ;;  %v1998_v54 = vmul.f32 %v3102_v53, %v3094_v2 }
 0x6fa   : > { %v1999_v49 = vmul.f32 %v3104_v23, %v3096_v39 }
 0x6fb   : > { %v2002_v0 = vpack.c.bf16 %v1998_v54, %v1998_v54 }
 0x6fc   : > { %v2003_v24 = vpack.c.bf16 %v1999_v49, %v1999_v49  ;;  %v2729_v49 = vld [vmem:[%s4343_s6] ss:$0 sm:$0xff] }
 0x6fd   : > { %2847 = vmatmul.mubr.msk.bf16.vlgmr.msra.gmra.mxu1 %vm1955_vm6, %v2002_v0  ;;  %v1513_v0 = vld [vmem:[%s1512_s12] sm:$0xff] }
 0x6fe   : > { %2853 = vmatmul.mubr.msk.bf16.vlgmr.msra.gmra.mxu0 %vm1955_vm6, %v2003_v24  ;;  %2860 = vmatprep.mubr.msk.bf16.mxu1 %vm3539_vm3, %v3538_v51 }
 0x6ff   : > { %2857 = vmatpush3.bf16.msra.mxu1 %v3087_v55 }
 0x700   : > { %2858 = vmatprep.subr.bf16.mxu1 %v3538_v51 }
 0x703   : > { %2859 = vmatpush3.bf16.msra.mxu1 %v3088_v28 }
 0x7b5   : > { %v2047_v56 = vpop.f32.mrf.mxu1 }
 0x7b6   : > { %v2096_v57 = vpop.f32.mrf.mxu0 }
 0x7b7   : > { %v2836_v59 = vpop.f32.mrf.mxu1 }
 0x7b8   : > { %v2842_v60 = vpop.f32.mrf.mxu0 }
 0x7b9   : > { %v2050_v61 = vpop.f32.mrf.mxu1 }
 0x7ba   : > { %v2099_v62 = vpop.f32.mrf.mxu0 }
 0x7bb   : > { %v2837_v63 = vpop.f32.mrf.mxu1 }
 0x7bc   : > { %v2843_v1 = vpop.f32.mrf.mxu0 }
 0x7bd   : > { %v2145_v3 = vpop.f32.mrf.mxu1 }
 0x7be   : > { %v2200_v4 = vcombine.low %v2047_v56, %v2145_v3  ;;  %v2201_v5 = vcombine.high %v2047_v56, %v2145_v3  ;;  %v2194_v6 = vpop.f32.mrf.mxu0 }
 0x7bf   : > { %v2216_v7 = vcombine.low %v2096_v57, %v2194_v6  ;;  %v2217_v8 = vcombine.high %v2096_v57, %v2194_v6  ;;  %v2848_v9 = vpop.f32.mrf.mxu1 }
 0x7c0   : > { %v2208_v12 = vrot.slane %v2200_v4, %v4087_v13  ;;  %v2215_v14 = vrot.slane %v2201_v5, %v4087_v13  ;;  %v2854_v51 = vpop.f32.mrf.mxu0 }
 0x7c1   : > { %v2224_v15 = vrot.slane %v2216_v7, %v4087_v13  ;;  %v2231_v16 = vrot.slane %v2217_v8, %v4087_v13  ;;  %v2148_v17 = vpop.f32.mrf.mxu1 }
 0x7c2   : > { %v2197_v18 = vpop.f32.mrf.mxu0 }
 0x7c3   : > { %v2232_v20 = vcombine.low %v2208_v12, %v2224_v15  ;;  %v2233_v21 = vcombine.high %v2208_v12, %v2224_v15  ;;  %v2248_v22 = vcombine.low %v2215_v14, %v2231_v16  ;;  %v2249_v25 = vcombine.high %v2215_v14, %v2231_v16  ;;  %v2849_v26 = vpop.f32.mrf.mxu1 }
 0x7c4   : > { %v2855_v27 = vpop.f32.mrf.mxu0 }
 0x7c5   : > { %v2240_v29 = vrot.slane %v2232_v20, %v4089_v19  ;;  %v2247_v30 = vrot.slane %v2233_v21, %v4089_v19  ;;  %v2256_v31 = vrot.slane %v2248_v22, %v4089_v19  ;;  %v2263_v32 = vrot.slane %v2249_v25, %v4089_v19 }
 0x7c7   : > { %v2268_v33 = vcombine.low %v2240_v29, %v2247_v30  ;;  %v2727_v36 = vcombine.high %v2240_v29, %v2247_v30  ;;  %v2284_v37 = vcombine.low %v2256_v31, %v2263_v32  ;;  %v2728_v38 = vcombine.high %v2256_v31, %v2263_v32 }
 0x7c9   : > { %v2275_v2 = vrot.slane %v2268_v33, %v4087_v13  ;;  %v2283_v39 = vrot.slane %v2727_v36, %v4087_v13  ;;  %v2291_v40 = vrot.slane %v2284_v37, %v4087_v13  ;;  %v2299_v41 = vrot.slane %v2728_v38, %v4087_v13 }
 0x7cb   : > { %v2301_v42 = vcombine.high %v2275_v2, %v2283_v39  ;;  %v2317_v43 = vcombine.high %v2291_v40, %v2299_v41  ;;  %v2300_v44 = vcombine.low %v2275_v2, %v2283_v39  ;;  %v2316_v34 = vcombine.low %v2291_v40, %v2299_v41 }
 0x7cd   : > { %v2315_v45 = vrot.slane %v2301_v42, %v4089_v19  ;;  %v2331_v35 = vrot.slane %v2317_v43, %v4089_v19  ;;  %v2308_v46 = vrot.slane %v2300_v44, %v4089_v19  ;;  %v2324_v47 = vrot.slane %v2316_v34, %v4089_v19 }
 0x7cf   : > { %v2334_v48 = vcombine.low %v2315_v45, %v2331_v35  ;;  %v2333_v11 = vcombine.high %v2308_v46, %v2324_v47  ;;  %v2332_v10 = vcombine.low %v2308_v46, %v2324_v47  ;;  %v2335_v13 = vcombine.high %v2315_v45, %v2331_v35 }
 0x7d1   : > { %2341 = vrot.lane.b32.xlu1 %v2334_v48, %s3545_s4  ;;  %2337 = vrot.lane.b32.xlu0 %v2333_v11, %s3546_s8  ;;  %s4344_s4 = sld [smem:[#allocation51_spill]]  ;;  %s3375_s8 = sshll.u32 %s3548_s20, 4  ;;  %s3376_s8 = int_to_ptr.vmem [resolvable:$false] %s3375_s8 }
 0x7d2   : > { %p3378_p7 = scmp.lt.s32.totalorder %s4178_s5, %s3376_s8 }
 0x7d5   : > { %2345 = vrot.lane.b32.xlu1 %v2335_v13, %s3547_s11  ;;  %s3377_s11 = scalar_lea.vmem %s3376_s8, 256 }
 0x7d6   : > { %p3379_p1 = scmp.lt.s32.totalorder %s3377_s11, %s3371_s7 }
 0x7d7   : > { %s4176_s29 = scalar_lea.hbm %s4344_s4, %s2735_s21 }
 0x7d8   : > { %p3380_p2 = por %p3379_p1, %p3378_p7 }
 0x7da   : > { %p3381_p6 = pnand %p3380_p2, %p3374_p4 }
 0x843   : > { %v2342_v50 = vpop.permute.xlu1 %2341  ;;  %v2338_v58 = vpop.permute.xlu0 %2337 }
 0x844   : > { %v2348_v52 = vsel %vm1755_vm5, %v2332_v10, %v2338_v58 }
 0x845   : > { %v2349_v53 = vsel %vm1955_vm6, %v2348_v52, %v2342_v50 }
 0x847   : > { %v2346_v19 = vpop.permute.xlu1 %2345 }
 0x848   : > { %v2351_v23 = vsel %vm2350_vm7, %v2349_v53, %v2346_v19 }
 0x849   : > { %v2352_v54 = vpack.c.bf16 %v2351_v23, %v2351_v23 }
 0x84b   : > { %2861 = vmatmul.mubr.msk.bf16.vlgmr.msra.gmra.mxu1 %vm1540_vm4, %v2352_v54 }
 0x90b   : > { %v2413_v24 = vpop.f32.mrf.mxu1 }
 0x90c   : > { %v2414_v55 = vadd.f32 %v2729_v49, %v2413_v24 }
 0x90d   : > { %v2862_v56 = vpop.f32.mrf.mxu1 }
 0x90e   : > { %v2419_v57 = vadd.f32 %v2414_v55, %v1513_v0 }
 0x90f   : > { %v2416_v59 = vpop.f32.mrf.mxu1 }
 0x910   : > { %2420 = vst.msk [vmem:[%s3925_s2] sm:$0xff] %vm1540_vm4, %v2419_v57 }
 0x911   : > { %v2863_v60 = vpop.f32.mrf.mxu1 }
 0x912   : > { %3384 = shalt.err (!%p3381_p6)
}
 0x913   : > { %s3385_s2 = scalar_lea.hbm %s4176_s29, 128  ;;  %s3389_s12 = scalar_lea.hbm %s4344_s4, 512 }
 0x914   : > { %p3386_p0 = scmp.ne.s32.totalorder %s4176_s29, %s3385_s2  ;;  %p3390_p3 = scmp.lt.s32.totalorder %s4176_s29, %s4344_s4 }
 0x915   : > { %p3391_p8 = scmp.lt.s32.totalorder %s3389_s12, %s3385_s2 }
 0x916   : > { %p3387_p10 = pnand %p3386_p0, %p3845_p5 }
 0x917   : > { %p3392_p12 = por %p3391_p8, %p3390_p3 }
 0x918   : > { %p3388_p13 = pneg %p3387_p10 }
 0x91a   : > { %p3393_p9 = pnand %p3392_p12, %p3388_p13 }
 0x91c   : > { %3396 = shalt.err (!%p3393_p9)
}
 0x91d   : > { %2898 = dma.vmem_to_hbm [thread:$0]  (%p3845_p5), %s4178_s5, 128, %s4176_s29, %s2422_s15  }
 0x91e PF: > { %p2951_p4 = scmp.ge.s32.totalorder %s3515_s18, 2  ;;  %s2449_s3 = sand.u32 1, %s3475_s25  }
 0x91f   : > { %s2450_s6 = scalar_lea.sflag [#allocation7], %s2449_s3 }
 0x920   : > { %p2933_p7 = pnand %p2951_p4, %p3851_p11 }
 0x922   : > { %p2934_p1 = pneg %p2933_p7 }
 0x924   : > { %3470 = dma.done.wait (%p2934_p1), %s2450_s6, 128  }
 0x925   : > { %3472 = vsyncadd (%p2934_p1), %s2450_s6, 4294967168  ;;  %s36_s18 = sadd.s32 1, %s3515_s18   ;;  %s4345_s28 = sld [smem:[#allocation31_spill]] }
 0x926   : > { %p33_p2 = scmp.ge.s32.totalorder %s36_s18, 6   ;;  %s4346_s22 = sld [smem:[#allocation36_spill]] }
 0x927   : > { %s4347_s21 = sld [smem:[#allocation37_spill]]  ;;  %s4348_s25 = smov %s3479_s26 }
 0x928   : > { %s4349_s26 = smov %s3483_s27  ;;  %s4350_s27 = smov %s3862_s24 }
 0x929   : > { %s4351_s29 = smov %s3495_s30  ;;  %s4352_s30 = smov %s3859_s9 }
 0x92a   : > { %s4353_s14 = smov %s3507_s16  ;;  %s4354_s15 = smov %s3511_s17 }
 0x92b   :  { %35 = sbr.rel (!%p33_p2) target bundleno = 30 (0x1e), region = 175 }
 0x92c   : > { %s4355_s16 = smov %s4346_s22 }
 0x92d   : > { %s4356_s17 = smov %s4347_s21 }
 0x930   :  { %2455 = vsyncpa [#allocation6], 1 }
 0x931   :  { %2457 = vsyncpa [#allocation6 + $0x1], 1 }
 0x932   :  { %2458 = vsyncpa [#allocation9], 1 }
 0x933   :  { %2460 = vsyncpa [#allocation9 + $0x1], 1 }
 0x934   :  { %2461 = vsyncpa [#allocation12], 1 }
 0x935   :  { %2462 = vsyncpa [#allocation15], 1 }
 0x936   :  { %2463 = vsyncpa [#allocation18], 1 }
 0x937   :  { %2464 = vsyncpa [#allocation21], 1 }
 0x938   :  { %2465 = vsyncpa [#allocation7], 1 }
 0x939   :  { %2467 = vsyncpa [#allocation7 + $0x1], 1 }

</bundles_post_ra>
